<compile_context>
chip_gen: v5e
topology: v5e:2x2
jax: 0.10.0
libtpu: 0.0.40
codegen_flags: <defaults>
</compile_context>

<pallas_src>
import jax
import jax.numpy as jnp
from jax.experimental import pallas as pl
from jax.experimental.pallas import tpu as pltpu

EPS = 1e-5  # nn.LayerNorm default


def _layernorm(x, w, b):
    # Single-pass statistics: two independent lane reductions (XLU pipelines them),
    # var = E[x^2] - mean^2.  Matches PyTorch LayerNorm (biased var, eps=1e-5).
    n = x.shape[-1]
    s1 = jnp.sum(x, axis=-1, keepdims=True)
    s2 = jnp.sum(x * x, axis=-1, keepdims=True)
    mean = s1 * (1.0 / n)
    var = jnp.maximum(s2 * (1.0 / n) - mean * mean, 0.0)
    inv = jax.lax.rsqrt(var + EPS)
    return (x - mean) * inv * w + b


def _layernorm_ref(x, w, b):
    # PyTorch-faithful two-pass version (reference only).
    mean = jnp.mean(x, axis=-1, keepdims=True)
    xc = x - mean
    var = jnp.mean(xc * xc, axis=-1, keepdims=True)
    return xc * jax.lax.rsqrt(var + EPS) * w + b


def _mlp_encoder_kernel(
    x_ref,
    w_emb, b_emb,
    ln_in_w, ln_in_b,
    w0, b0, w1, b1, w2, b2, w_out, b_out,
    ln_out_w, ln_out_b,
    h_ref, init_h_ref,
):
    x = x_ref[...].astype(jnp.float32)
    tile = x.shape[0]
    feat = x.shape[1]
    we = w_emb[...]                      # f32 (F, E): stays on the VPU
    emb = we.shape[1]

    # --- init embedding: Linear(feat -> embed) on the VPU (F is tiny; a 4-deep
    #     MXU contraction would waste a full systolic pass). ---
    init_h = jnp.broadcast_to(b_emb[...], (tile, emb)).astype(jnp.float32)
    for f in range(feat):                # static unroll, feat = 4
        init_h = init_h + x[:, f:f + 1] * we[f:f + 1, :]
    init_h_ref[...] = init_h.astype(init_h_ref.dtype)

    # --- CustomMLP: LN -> [Linear+ReLU] x3 -> Linear -> LN ---
    def dense(h, w_ref, b_ref):
        # bf16 operands on the MXU, f32 accumulation, f32 bias add.
        return jnp.dot(h.astype(jnp.bfloat16), w_ref[...],
                       preferred_element_type=jnp.float32) + b_ref[...]

    h = _layernorm(init_h, ln_in_w[...], ln_in_b[...])
    h = jnp.maximum(dense(h, w0, b0), 0.0)
    h = jnp.maximum(dense(h, w1, b1), 0.0)
    h = jnp.maximum(dense(h, w2, b2), 0.0)
    h = dense(h, w_out, b_out)           # output layer, Identity activation
    h = _layernorm(h, ln_out_w[...], ln_out_b[...])
    h_ref[...] = h.astype(h_ref.dtype)


def _pick_tile_rows(rows, target=512):
    """Largest multiple of 8 that divides `rows`, <= target, and leaves >= 2 grid
    steps when possible (keeps both v7x TensorCores busy and lets BlockSpec
    double-buffering overlap x/out DMA with compute)."""
    if rows % 8 != 0:
        return rows
    cap = max(8, min(target, rows // 2) if rows >= 16 else rows)
    best = 8
    t = 8
    while t <= cap:
        if rows % t == 0:
            best = t
        t += 8
    return best


def mlp_encoder_forward(x, params, *, tile_rows=None):
    """x: (B, S, F) float32.  Returns (h, init_h), each (B, S, E)."""
    B, S, F = x.shape
    E = params["w_emb"].shape[1]
    H = params["w0"].shape[1]
    rows = B * S
    if tile_rows is None:
        tile_rows = _pick_tile_rows(rows)
    assert rows % tile_rows == 0 and tile_rows % 8 == 0

    x2 = x.reshape(rows, F)

    # Cast the MXU-feeding weights to bf16 once in the wrapper; keep biases,
    # LayerNorm affines and the VPU init-embedding weight in f32.
    mxu_weights = {"w0", "w1", "w2", "w_out"}
    param_order = [
        "w_emb", "b_emb",
        "ln_in_w", "ln_in_b",
        "w0", "b0", "w1", "b1", "w2", "b2", "w_out", "b_out",
        "ln_out_w", "ln_out_b",
    ]
    param_vals = [
        params[k].astype(jnp.bfloat16) if k in mxu_weights else params[k]
        for k in param_order
    ]

    def full_spec(shape):
        nd = len(shape)
        return pl.BlockSpec(shape, lambda i, _nd=nd: (0,) * _nd)

    param_specs = [full_spec(p.shape) for p in param_vals]
    # NOTE: weight specs have constant index_maps so they stay resident; for very
    # large E/H on v7x (64 MiB VMEM) consider pipeline_mode=pl.Buffered(1) or a
    # one-shot make_async_copy stage to avoid double-buffered weight copies.

    # Cost estimate: 5 GEMMs + LayerNorms (2 rsqrt per row).
    flops = 2 * rows * (F * E + E * H + 2 * H * H + H * E) + 12 * rows * E
    bytes_params = sum(int(p.size) * p.dtype.itemsize for p in param_vals)
    bytes_accessed = (int(x2.size) * x2.dtype.itemsize
                      + 2 * rows * E * 4
                      + bytes_params)
    cost = pl.CostEstimate(flops=flops, transcendentals=2 * rows,
                           bytes_accessed=bytes_accessed)

    # VMEM budget: double-buffered x tile + 2 output tiles + (double-buffered) params.
    tile_bytes = 2 * (tile_rows * F * 4 + 2 * tile_rows * E * 4) + 2 * bytes_params
    vmem_limit = int(min(max(tile_bytes + (8 << 20), 32 << 20), 48 << 20))

    grid = (rows // tile_rows,)
    h2, init_h2 = pl.pallas_call(
        _mlp_encoder_kernel,
        out_shape=(
            jax.ShapeDtypeStruct((rows, E), x.dtype),
            jax.ShapeDtypeStruct((rows, E), x.dtype),
        ),
        grid_spec=pltpu.PrefetchScalarGridSpec(
            num_scalar_prefetch=0,
            grid=grid,
            in_specs=[pl.BlockSpec((tile_rows, F), lambda i: (i, 0))] + param_specs,
            out_specs=[
                pl.BlockSpec((tile_rows, E), lambda i: (i, 0)),
                pl.BlockSpec((tile_rows, E), lambda i: (i, 0)),
            ],
        ),
        compiler_params=pltpu.CompilerParams(
            dimension_semantics=("parallel",),
            vmem_limit_bytes=vmem_limit,
        ),
        cost_estimate=cost,
    )(x2, *param_vals)

    return h2.reshape(B, S, E), init_h2.reshape(B, S, E)


def init_params(key, feat_dim, embed_dim, hidden, num_layers=3):
    """Deterministic synthetic parameters.  Linear weights stored as (in, out)."""
    assert num_layers == 3  # kernel is specialized for 3 hidden layers
    keys = jax.random.split(key, 8)

    def lin(k, din, dout):
        scale = 1.0 / jnp.sqrt(din)
        kw, kb = jax.random.split(k)
        w = jax.random.uniform(kw, (din, dout), jnp.float32, -scale, scale)
        b = jax.random.uniform(kb, (1, dout), jnp.float32, -scale, scale)
        return w, b

    p = {}
    p["w_emb"], p["b_emb"] = lin(keys[0], feat_dim, embed_dim)
    p["w0"], p["b0"] = lin(keys[1], embed_dim, hidden)
    p["w1"], p["b1"] = lin(keys[2], hidden, hidden)
    p["w2"], p["b2"] = lin(keys[3], hidden, hidden)
    p["w_out"], p["b_out"] = lin(keys[4], hidden, embed_dim)
    # LayerNorm affine params (PyTorch default init: weight=1, bias=0)
    p["ln_in_w"] = jnp.ones((1, embed_dim), jnp.float32)
    p["ln_in_b"] = jnp.zeros((1, embed_dim), jnp.float32)
    p["ln_out_w"] = jnp.ones((1, embed_dim), jnp.float32)
    p["ln_out_b"] = jnp.zeros((1, embed_dim), jnp.float32)
    return p


def reference_forward(x, params, *, mxu_bf16=True):
    """Pure-JAX reference of the same forward pass.

    mxu_bf16=True mirrors the kernel's bf16-operand / f32-accumulate matmuls so
    the comparison isolates kernel bugs rather than bf16 rounding.
    """
    B, S, F = x.shape
    x2 = x.reshape(-1, F)

    # Init embedding: same f32 VPU-style FMA order as the kernel.
    init_h = jnp.broadcast_to(params["b_emb"], (x2.shape[0], params["w_emb"].shape[1]))
    for f in range(F):
        init_h = init_h + x2[:, f:f + 1] * params["w_emb"][f:f + 1, :]

    def mm(a, w):
        if mxu_bf16:
            a = a.astype(jnp.bfloat16)
            w = w.astype(jnp.bfloat16)
        return jnp.dot(a, w, preferred_element_type=jnp.float32)

    h = _layernorm_ref(init_h, params["ln_in_w"], params["ln_in_b"])
    h = jnp.maximum(mm(h, params["w0"]) + params["b0"], 0.0)
    h = jnp.maximum(mm(h, params["w1"]) + params["b1"], 0.0)
    h = jnp.maximum(mm(h, params["w2"]) + params["b2"], 0.0)
    h = mm(h, params["w_out"]) + params["b_out"]
    h = _layernorm_ref(h, params["ln_out_w"], params["ln_out_b"])
    E = h.shape[-1]
    return h.reshape(B, S, E), init_h.reshape(B, S, E)


if __name__ == "__main__":
    # Small shapes consistent with the module defaults: batch=2, seq=8 tokens,
    # 4 raw features per token, embed_dim=128, feedforward_hidden=512, num_layers=3.
    B, S, F = 2, 8, 4
    EMBED_DIM, HIDDEN = 128, 512

    key = jax.random.PRNGKey(0)
    kx, kp = jax.random.split(key)
    # TODO(synk): the original module consumes a TensorDict + env-specific
    # init_embedding; here the "environment state" is a dense (B, S, F) feature
    # tensor and init_embedding is a Linear(F -> embed_dim).
    x = jax.random.normal(kx, (B, S, F), jnp.float32)
    params = init_params(kp, F, EMBED_DIM, HIDDEN, num_layers=3)

    h, init_h = mlp_encoder_forward(x, params)   # auto-tiled: grid has >= 2 steps
    jax.block_until_ready((h, init_h))

    h_ref, init_h_ref = reference_forward(x, params, mxu_bf16=True)
    assert h.shape == (B, S, EMBED_DIM) and init_h.shape == (B, S, EMBED_DIM)
    # init embedding is pure f32 in both paths -> tight tolerance.
    assert jnp.allclose(init_h, init_h_ref, atol=1e-4, rtol=1e-4)
    # MLP path uses bf16 MXU operands (mirrored in the reference).
    assert jnp.allclose(h, h_ref, atol=5e-3, rtol=5e-3)

    print("KERNEL_OK")
</pallas_src>

<mosaic_0001>
module attributes {stable_mosaic.version = 11 : i64} {
  func.func @_mlp_encoder_kernel(%arg0: i32, %arg1: memref<8x4xf32, #tpu.memory_space<vmem>>, %arg2: memref<4x128xf32, #tpu.memory_space<vmem>>, %arg3: memref<1x128xf32, #tpu.memory_space<vmem>>, %arg4: memref<1x128xf32, #tpu.memory_space<vmem>>, %arg5: memref<1x128xf32, #tpu.memory_space<vmem>>, %arg6: memref<128x512xbf16, #tpu.memory_space<vmem>>, %arg7: memref<1x512xf32, #tpu.memory_space<vmem>>, %arg8: memref<512x512xbf16, #tpu.memory_space<vmem>>, %arg9: memref<1x512xf32, #tpu.memory_space<vmem>>, %arg10: memref<512x512xbf16, #tpu.memory_space<vmem>>, %arg11: memref<1x512xf32, #tpu.memory_space<vmem>>, %arg12: memref<512x128xbf16, #tpu.memory_space<vmem>>, %arg13: memref<1x128xf32, #tpu.memory_space<vmem>>, %arg14: memref<1x128xf32, #tpu.memory_space<vmem>>, %arg15: memref<1x128xf32, #tpu.memory_space<vmem>>, %arg16: memref<8x128xf32, #tpu.memory_space<vmem>>, %arg17: memref<8x128xf32, #tpu.memory_space<vmem>>) attributes {dimension_semantics = [#tpu.dimension_semantics<parallel>], iteration_bounds = array<i64: 2>, scalar_prefetch = 0 : i64, scratch_operands = 0 : i64, tpu.core_type = #tpu.core_type<tc>, window_params = [{transform_indices = @transform_0, window_bounds = array<i64: 8, 4>}, {pipeline_mode = #tpu.pipeline_mode<synchronous>, transform_indices = @transform_1, window_bounds = array<i64: 4, 128>}, {pipeline_mode = #tpu.pipeline_mode<synchronous>, transform_indices = @transform_2, window_bounds = array<i64: 1, 128>}, {pipeline_mode = #tpu.pipeline_mode<synchronous>, transform_indices = @transform_3, window_bounds = array<i64: 1, 128>}, {pipeline_mode = #tpu.pipeline_mode<synchronous>, transform_indices = @transform_4, window_bounds = array<i64: 1, 128>}, {pipeline_mode = #tpu.pipeline_mode<synchronous>, transform_indices = @transform_5, window_bounds = array<i64: 128, 512>}, {pipeline_mode = #tpu.pipeline_mode<synchronous>, transform_indices = @transform_6, window_bounds = array<i64: 1, 512>}, {pipeline_mode = #tpu.pipeline_mode<synchronous>, transform_indices = @transform_7, window_bounds = array<i64: 512, 512>}, {pipeline_mode = #tpu.pipeline_mode<synchronous>, transform_indices = @transform_8, window_bounds = array<i64: 1, 512>}, {pipeline_mode = #tpu.pipeline_mode<synchronous>, transform_indices = @transform_9, window_bounds = array<i64: 512, 512>}, {pipeline_mode = #tpu.pipeline_mode<synchronous>, transform_indices = @transform_10, window_bounds = array<i64: 1, 512>}, {pipeline_mode = #tpu.pipeline_mode<synchronous>, transform_indices = @transform_11, window_bounds = array<i64: 512, 128>}, {pipeline_mode = #tpu.pipeline_mode<synchronous>, transform_indices = @transform_12, window_bounds = array<i64: 1, 128>}, {pipeline_mode = #tpu.pipeline_mode<synchronous>, transform_indices = @transform_13, window_bounds = array<i64: 1, 128>}, {pipeline_mode = #tpu.pipeline_mode<synchronous>, transform_indices = @transform_14, window_bounds = array<i64: 1, 128>}, {transform_indices = @transform_15, window_bounds = array<i64: 8, 128>}, {transform_indices = @transform_16, window_bounds = array<i64: 8, 128>}]} {
    %c0 = arith.constant 0 : index
    %c0_0 = arith.constant 0 : index
    %0 = vector.load %arg1[%c0, %c0_0] : memref<8x4xf32, #tpu.memory_space<vmem>>, vector<8x4xf32>
    %c0_1 = arith.constant 0 : index
    %c0_2 = arith.constant 0 : index
    %1 = vector.load %arg2[%c0_1, %c0_2] : memref<4x128xf32, #tpu.memory_space<vmem>>, vector<4x128xf32>
    %c0_3 = arith.constant 0 : index
    %c0_4 = arith.constant 0 : index
    %2 = vector.load %arg3[%c0_3, %c0_4] : memref<1x128xf32, #tpu.memory_space<vmem>>, vector<1x128xf32>
    %3 = vector.shape_cast %2 : vector<1x128xf32> to vector<1x128xf32>
    %4 = vector.broadcast %3 : vector<1x128xf32> to vector<8x128xf32>
    %5 = vector.extract_strided_slice %0 {offsets = [0, 0], sizes = [8, 1], strides = [1, 1]} : vector<8x4xf32> to vector<8x1xf32>
    %6 = vector.extract_strided_slice %1 {offsets = [0, 0], sizes = [1, 128], strides = [1, 1]} : vector<4x128xf32> to vector<1x128xf32>
    %7 = vector.broadcast %5 : vector<8x1xf32> to vector<8x128xf32>
    %8 = vector.broadcast %6 : vector<1x128xf32> to vector<8x128xf32>
    %9 = arith.mulf %7, %8 : vector<8x128xf32>
    %10 = arith.addf %4, %9 : vector<8x128xf32>
    %11 = vector.extract_strided_slice %0 {offsets = [0, 1], sizes = [8, 1], strides = [1, 1]} : vector<8x4xf32> to vector<8x1xf32>
    %12 = vector.extract_strided_slice %1 {offsets = [1, 0], sizes = [1, 128], strides = [1, 1]} : vector<4x128xf32> to vector<1x128xf32>
    %13 = vector.broadcast %11 : vector<8x1xf32> to vector<8x128xf32>
    %14 = vector.broadcast %12 : vector<1x128xf32> to vector<8x128xf32>
    %15 = arith.mulf %13, %14 : vector<8x128xf32>
    %16 = arith.addf %10, %15 : vector<8x128xf32>
    %17 = vector.extract_strided_slice %0 {offsets = [0, 2], sizes = [8, 1], strides = [1, 1]} : vector<8x4xf32> to vector<8x1xf32>
    %18 = vector.extract_strided_slice %1 {offsets = [2, 0], sizes = [1, 128], strides = [1, 1]} : vector<4x128xf32> to vector<1x128xf32>
    %19 = vector.broadcast %17 : vector<8x1xf32> to vector<8x128xf32>
    %20 = vector.broadcast %18 : vector<1x128xf32> to vector<8x128xf32>
    %21 = arith.mulf %19, %20 : vector<8x128xf32>
    %22 = arith.addf %16, %21 : vector<8x128xf32>
    %23 = vector.extract_strided_slice %0 {offsets = [0, 3], sizes = [8, 1], strides = [1, 1]} : vector<8x4xf32> to vector<8x1xf32>
    %24 = vector.extract_strided_slice %1 {offsets = [3, 0], sizes = [1, 128], strides = [1, 1]} : vector<4x128xf32> to vector<1x128xf32>
    %25 = vector.broadcast %23 : vector<8x1xf32> to vector<8x128xf32>
    %26 = vector.broadcast %24 : vector<1x128xf32> to vector<8x128xf32>
    %27 = arith.mulf %25, %26 : vector<8x128xf32>
    %28 = arith.addf %22, %27 : vector<8x128xf32>
    %c0_5 = arith.constant 0 : index
    %c0_6 = arith.constant 0 : index
    %29 = vector.load %arg17[%c0_5, %c0_6] : memref<8x128xf32, #tpu.memory_space<vmem>>, vector<8x128xf32>
    tpu.vector_store %arg17[%c0_5, %c0_6], %28 {strides = array<i32>} : memref<8x128xf32, #tpu.memory_space<vmem>>, vector<8x128xf32>,
    %c0_7 = arith.constant 0 : index
    %c0_8 = arith.constant 0 : index
    %30 = vector.load %arg4[%c0_7, %c0_8] : memref<1x128xf32, #tpu.memory_space<vmem>>, vector<1x128xf32>
    %c0_9 = arith.constant 0 : index
    %c0_10 = arith.constant 0 : index
    %31 = vector.load %arg5[%c0_9, %c0_10] : memref<1x128xf32, #tpu.memory_space<vmem>>, vector<1x128xf32>
    %cst = arith.constant dense<0.000000e+00> : vector<8xf32>
    %32 = vector.multi_reduction <add>, %28, %cst [1] : vector<8x128xf32> to vector<8xf32>
    %33 = vector.shape_cast %32 : vector<8xf32> to vector<8x1xf32>
    %34 = arith.mulf %28, %28 : vector<8x128xf32>
    %cst_11 = arith.constant dense<0.000000e+00> : vector<8xf32>
    %35 = vector.multi_reduction <add>, %34, %cst_11 [1] : vector<8x128xf32> to vector<8xf32>
    %36 = vector.shape_cast %35 : vector<8xf32> to vector<8x1xf32>
    %cst_12 = arith.constant 7.812500e-03 : f32
    %37 = vector.broadcast %cst_12 : f32 to vector<8x1xf32>
    %38 = arith.mulf %33, %37 : vector<8x1xf32>
    %cst_13 = arith.constant 7.812500e-03 : f32
    %39 = vector.broadcast %cst_13 : f32 to vector<8x1xf32>
    %40 = arith.mulf %36, %39 : vector<8x1xf32>
    %41 = arith.mulf %38, %38 : vector<8x1xf32>
    %42 = arith.subf %40, %41 : vector<8x1xf32>
    %cst_14 = arith.constant 0.000000e+00 : f32
    %43 = vector.broadcast %cst_14 : f32 to vector<8x1xf32>
    %44 = arith.maximumf %42, %43 : vector<8x1xf32>
    %cst_15 = arith.constant 9.99999974E-6 : f32
    %45 = vector.broadcast %cst_15 : f32 to vector<8x1xf32>
    %46 = arith.addf %44, %45 : vector<8x1xf32>
    %47 = math.rsqrt %46 : vector<8x1xf32>
    %48 = vector.broadcast %38 : vector<8x1xf32> to vector<8x128xf32>
    %49 = arith.subf %28, %48 : vector<8x128xf32>
    %50 = vector.broadcast %47 : vector<8x1xf32> to vector<8x128xf32>
    %51 = arith.mulf %49, %50 : vector<8x128xf32>
    %52 = vector.broadcast %30 : vector<1x128xf32> to vector<8x128xf32>
    %53 = arith.mulf %51, %52 : vector<8x128xf32>
    %54 = vector.broadcast %31 : vector<1x128xf32> to vector<8x128xf32>
    %55 = arith.addf %53, %54 : vector<8x128xf32>
    %56 = arith.truncf %55 : vector<8x128xf32> to vector<8x128xbf16>
    %c0_16 = arith.constant 0 : index
    %c0_17 = arith.constant 0 : index
    %57 = vector.load %arg6[%c0_16, %c0_17] : memref<128x512xbf16, #tpu.memory_space<vmem>>, vector<128x512xbf16>
    %cst_18 = arith.constant dense<0.000000e+00> : vector<8x512xf32>
    %58 = tpu.matmul %56, %57, %cst_18 {dimension_numbers = #tpu.dot_dimension_numbers<[1], [0], [0], [1], [0, 0, 1, 1], [], []>} : vector<8x128xbf16>, vector<128x512xbf16>, vector<8x512xf32> -> vector<8x512xf32>
    %c0_19 = arith.constant 0 : index
    %c0_20 = arith.constant 0 : index
    %59 = vector.load %arg7[%c0_19, %c0_20] : memref<1x512xf32, #tpu.memory_space<vmem>>, vector<1x512xf32>
    %60 = vector.broadcast %59 : vector<1x512xf32> to vector<8x512xf32>
    %61 = arith.addf %58, %60 : vector<8x512xf32>
    %cst_21 = arith.constant 0.000000e+00 : f32
    %62 = vector.broadcast %cst_21 : f32 to vector<8x512xf32>
    %63 = arith.maximumf %61, %62 : vector<8x512xf32>
    %64 = arith.truncf %63 : vector<8x512xf32> to vector<8x512xbf16>
    %c0_22 = arith.constant 0 : index
    %c0_23 = arith.constant 0 : index
    %65 = vector.load %arg8[%c0_22, %c0_23] : memref<512x512xbf16, #tpu.memory_space<vmem>>, vector<512x512xbf16>
    %cst_24 = arith.constant dense<0.000000e+00> : vector<8x512xf32>
    %66 = tpu.matmul %64, %65, %cst_24 {dimension_numbers = #tpu.dot_dimension_numbers<[1], [0], [0], [1], [0, 0, 1, 1], [], []>} : vector<8x512xbf16>, vector<512x512xbf16>, vector<8x512xf32> -> vector<8x512xf32>
    %c0_25 = arith.constant 0 : index
    %c0_26 = arith.constant 0 : index
    %67 = vector.load %arg9[%c0_25, %c0_26] : memref<1x512xf32, #tpu.memory_space<vmem>>, vector<1x512xf32>
    %68 = vector.broadcast %67 : vector<1x512xf32> to vector<8x512xf32>
    %69 = arith.addf %66, %68 : vector<8x512xf32>
    %cst_27 = arith.constant 0.000000e+00 : f32
    %70 = vector.broadcast %cst_27 : f32 to vector<8x512xf32>
    %71 = arith.maximumf %69, %70 : vector<8x512xf32>
    %72 = arith.truncf %71 : vector<8x512xf32> to vector<8x512xbf16>
    %c0_28 = arith.constant 0 : index
    %c0_29 = arith.constant 0 : index
    %73 = vector.load %arg10[%c0_28, %c0_29] : memref<512x512xbf16, #tpu.memory_space<vmem>>, vector<512x512xbf16>
    %cst_30 = arith.constant dense<0.000000e+00> : vector<8x512xf32>
    %74 = tpu.matmul %72, %73, %cst_30 {dimension_numbers = #tpu.dot_dimension_numbers<[1], [0], [0], [1], [0, 0, 1, 1], [], []>} : vector<8x512xbf16>, vector<512x512xbf16>, vector<8x512xf32> -> vector<8x512xf32>
    %c0_31 = arith.constant 0 : index
    %c0_32 = arith.constant 0 : index
    %75 = vector.load %arg11[%c0_31, %c0_32] : memref<1x512xf32, #tpu.memory_space<vmem>>, vector<1x512xf32>
    %76 = vector.broadcast %75 : vector<1x512xf32> to vector<8x512xf32>
    %77 = arith.addf %74, %76 : vector<8x512xf32>
    %cst_33 = arith.constant 0.000000e+00 : f32
    %78 = vector.broadcast %cst_33 : f32 to vector<8x512xf32>
    %79 = arith.maximumf %77, %78 : vector<8x512xf32>
    %80 = arith.truncf %79 : vector<8x512xf32> to vector<8x512xbf16>
    %c0_34 = arith.constant 0 : index
    %c0_35 = arith.constant 0 : index
    %81 = vector.load %arg12[%c0_34, %c0_35] : memref<512x128xbf16, #tpu.memory_space<vmem>>, vector<512x128xbf16>
    %cst_36 = arith.constant dense<0.000000e+00> : vector<8x128xf32>
    %82 = tpu.matmul %80, %81, %cst_36 {dimension_numbers = #tpu.dot_dimension_numbers<[1], [0], [0], [1], [0, 0, 1, 1], [], []>} : vector<8x512xbf16>, vector<512x128xbf16>, vector<8x128xf32> -> vector<8x128xf32>
    %c0_37 = arith.constant 0 : index
    %c0_38 = arith.constant 0 : index
    %83 = vector.load %arg13[%c0_37, %c0_38] : memref<1x128xf32, #tpu.memory_space<vmem>>, vector<1x128xf32>
    %84 = vector.broadcast %83 : vector<1x128xf32> to vector<8x128xf32>
    %85 = arith.addf %82, %84 : vector<8x128xf32>
    %c0_39 = arith.constant 0 : index
    %c0_40 = arith.constant 0 : index
    %86 = vector.load %arg14[%c0_39, %c0_40] : memref<1x128xf32, #tpu.memory_space<vmem>>, vector<1x128xf32>
    %c0_41 = arith.constant 0 : index
    %c0_42 = arith.constant 0 : index
    %87 = vector.load %arg15[%c0_41, %c0_42] : memref<1x128xf32, #tpu.memory_space<vmem>>, vector<1x128xf32>
    %cst_43 = arith.constant dense<0.000000e+00> : vector<8xf32>
    %88 = vector.multi_reduction <add>, %85, %cst_43 [1] : vector<8x128xf32> to vector<8xf32>
    %89 = vector.shape_cast %88 : vector<8xf32> to vector<8x1xf32>
    %90 = arith.mulf %85, %85 : vector<8x128xf32>
    %cst_44 = arith.constant dense<0.000000e+00> : vector<8xf32>
    %91 = vector.multi_reduction <add>, %90, %cst_44 [1] : vector<8x128xf32> to vector<8xf32>
    %92 = vector.shape_cast %91 : vector<8xf32> to vector<8x1xf32>
    %cst_45 = arith.constant 7.812500e-03 : f32
    %93 = vector.broadcast %cst_45 : f32 to vector<8x1xf32>
    %94 = arith.mulf %89, %93 : vector<8x1xf32>
    %cst_46 = arith.constant 7.812500e-03 : f32
    %95 = vector.broadcast %cst_46 : f32 to vector<8x1xf32>
    %96 = arith.mulf %92, %95 : vector<8x1xf32>
    %97 = arith.mulf %94, %94 : vector<8x1xf32>
    %98 = arith.subf %96, %97 : vector<8x1xf32>
    %cst_47 = arith.constant 0.000000e+00 : f32
    %99 = vector.broadcast %cst_47 : f32 to vector<8x1xf32>
    %100 = arith.maximumf %98, %99 : vector<8x1xf32>
    %cst_48 = arith.constant 9.99999974E-6 : f32
    %101 = vector.broadcast %cst_48 : f32 to vector<8x1xf32>
    %102 = arith.addf %100, %101 : vector<8x1xf32>
    %103 = math.rsqrt %102 : vector<8x1xf32>
    %104 = vector.broadcast %94 : vector<8x1xf32> to vector<8x128xf32>
    %105 = arith.subf %85, %104 : vector<8x128xf32>
    %106 = vector.broadcast %103 : vector<8x1xf32> to vector<8x128xf32>
    %107 = arith.mulf %105, %106 : vector<8x128xf32>
    %108 = vector.broadcast %86 : vector<1x128xf32> to vector<8x128xf32>
    %109 = arith.mulf %107, %108 : vector<8x128xf32>
    %110 = vector.broadcast %87 : vector<1x128xf32> to vector<8x128xf32>
    %111 = arith.addf %109, %110 : vector<8x128xf32>
    %c0_49 = arith.constant 0 : index
    %c0_50 = arith.constant 0 : index
    %112 = vector.load %arg16[%c0_49, %c0_50] : memref<8x128xf32, #tpu.memory_space<vmem>>, vector<8x128xf32>
    tpu.vector_store %arg16[%c0_49, %c0_50], %111 {strides = array<i32>} : memref<8x128xf32, #tpu.memory_space<vmem>>, vector<8x128xf32>,
    return
  }
  func.func @transform_0(%arg0: i32) -> (i32, i32) {
    %c0_i32 = arith.constant 0 : i32
    %c0_i32_0 = arith.constant 0 : i32
    return %arg0, %c0_i32 : i32, i32
  }
  func.func @transform_1(%arg0: i32) -> (i32, i32) {
    %c0_i32 = arith.constant 0 : i32
    %c0_i32_0 = arith.constant 0 : i32
    %c0_i32_1 = arith.constant 0 : i32
    return %c0_i32, %c0_i32_0 : i32, i32
  }
  func.func @transform_2(%arg0: i32) -> (i32, i32) {
    %c0_i32 = arith.constant 0 : i32
    %c0_i32_0 = arith.constant 0 : i32
    %c0_i32_1 = arith.constant 0 : i32
    return %c0_i32, %c0_i32_0 : i32, i32
  }
  func.func @transform_3(%arg0: i32) -> (i32, i32) {
    %c0_i32 = arith.constant 0 : i32
    %c0_i32_0 = arith.constant 0 : i32
    %c0_i32_1 = arith.constant 0 : i32
    return %c0_i32, %c0_i32_0 : i32, i32
  }
  func.func @transform_4(%arg0: i32) -> (i32, i32) {
    %c0_i32 = arith.constant 0 : i32
    %c0_i32_0 = arith.constant 0 : i32
    %c0_i32_1 = arith.constant 0 : i32
    return %c0_i32, %c0_i32_0 : i32, i32
  }
  func.func @transform_5(%arg0: i32) -> (i32, i32) {
    %c0_i32 = arith.constant 0 : i32
    %c0_i32_0 = arith.constant 0 : i32
    %c0_i32_1 = arith.constant 0 : i32
    return %c0_i32, %c0_i32_0 : i32, i32
  }
  func.func @transform_6(%arg0: i32) -> (i32, i32) {
    %c0_i32 = arith.constant 0 : i32
    %c0_i32_0 = arith.constant 0 : i32
    %c0_i32_1 = arith.constant 0 : i32
    return %c0_i32, %c0_i32_0 : i32, i32
  }
  func.func @transform_7(%arg0: i32) -> (i32, i32) {
    %c0_i32 = arith.constant 0 : i32
    %c0_i32_0 = arith.constant 0 : i32
    %c0_i32_1 = arith.constant 0 : i32
    return %c0_i32, %c0_i32_0 : i32, i32
  }
  func.func @transform_8(%arg0: i32) -> (i32, i32) {
    %c0_i32 = arith.constant 0 : i32
    %c0_i32_0 = arith.constant 0 : i32
    %c0_i32_1 = arith.constant 0 : i32
    return %c0_i32, %c0_i32_0 : i32, i32
  }
  func.func @transform_9(%arg0: i32) -> (i32, i32) {
    %c0_i32 = arith.constant 0 : i32
    %c0_i32_0 = arith.constant 0 : i32
    %c0_i32_1 = arith.constant 0 : i32
    return %c0_i32, %c0_i32_0 : i32, i32
  }
  func.func @transform_10(%arg0: i32) -> (i32, i32) {
    %c0_i32 = arith.constant 0 : i32
    %c0_i32_0 = arith.constant 0 : i32
    %c0_i32_1 = arith.constant 0 : i32
    return %c0_i32, %c0_i32_0 : i32, i32
  }
  func.func @transform_11(%arg0: i32) -> (i32, i32) {
    %c0_i32 = arith.constant 0 : i32
    %c0_i32_0 = arith.constant 0 : i32
    %c0_i32_1 = arith.constant 0 : i32
    return %c0_i32, %c0_i32_0 : i32, i32
  }
  func.func @transform_12(%arg0: i32) -> (i32, i32) {
    %c0_i32 = arith.constant 0 : i32
    %c0_i32_0 = arith.constant 0 : i32
    %c0_i32_1 = arith.constant 0 : i32
    return %c0_i32, %c0_i32_0 : i32, i32
  }
  func.func @transform_13(%arg0: i32) -> (i32, i32) {
    %c0_i32 = arith.constant 0 : i32
    %c0_i32_0 = arith.constant 0 : i32
    %c0_i32_1 = arith.constant 0 : i32
    return %c0_i32, %c0_i32_0 : i32, i32
  }
  func.func @transform_14(%arg0: i32) -> (i32, i32) {
    %c0_i32 = arith.constant 0 : i32
    %c0_i32_0 = arith.constant 0 : i32
    %c0_i32_1 = arith.constant 0 : i32
    return %c0_i32, %c0_i32_0 : i32, i32
  }
  func.func @transform_15(%arg0: i32) -> (i32, i32) {
    %c0_i32 = arith.constant 0 : i32
    %c0_i32_0 = arith.constant 0 : i32
    return %arg0, %c0_i32 : i32, i32
  }
  func.func @transform_16(%arg0: i32) -> (i32, i32) {
    %c0_i32 = arith.constant 0 : i32
    %c0_i32_0 = arith.constant 0 : i32
    return %arg0, %c0_i32 : i32, i32
  }
}

</mosaic_0001>

<bundles_post_ra>
// kernel: tpu_custom_call.1
= control target key start
LH: loop header
LB: loop body
LE: loop exit
PB: predicated region body
PF: predicated region fallthrough
CT: control target
= control target key end

     0   :  { %s5765_s0 = inlined_call_operand.vmem [shape: f32[16,4], index: 0, kind: input, shape index: {}]   ;;  %s5766_s1 = inlined_call_operand.vmem [shape: f32[4,128], index: 1, kind: input, shape index: {}]   ;;  %s5767_s2 = inlined_call_operand.vmem [shape: f32[1,128], index: 2, kind: input, shape index: {}]   ;;  %s5768_s3 = inlined_call_operand.vmem [shape: f32[1,128], index: 3, kind: input, shape index: {}]   ;;  %s5769_s4 = inlined_call_operand.vmem [shape: f32[1,128], index: 4, kind: input, shape index: {}]   ;;  %s5770_s5 = inlined_call_operand.hbm [shape: bf16[128,512], index: 5, kind: input, shape index: {}]   ;;  %s5771_s6 = inlined_call_operand.vmem [shape: f32[1,512], index: 6, kind: input, shape index: {}]   ;;  %s5772_s7 = inlined_call_operand.hbm [shape: bf16[512,512], index: 7, kind: input, shape index: {}]   ;;  %s5773_s8 = inlined_call_operand.vmem [shape: f32[1,512], index: 8, kind: input, shape index: {}]   ;;  %s5774_s9 = inlined_call_operand.hbm [shape: bf16[512,512], index: 9, kind: input, shape index: {}]   ;;  %s5775_s10 = inlined_call_operand.vmem [shape: f32[1,512], index: 10, kind: input, shape index: {}]   ;;  %s5776_s11 = inlined_call_operand.hbm [shape: bf16[512,128], index: 11, kind: input, shape index: {}]   ;;  %s5777_s12 = inlined_call_operand.vmem [shape: f32[1,128], index: 12, kind: input, shape index: {}]   ;;  %s5778_s13 = inlined_call_operand.vmem [shape: f32[1,128], index: 13, kind: input, shape index: {}]   ;;  %s5779_s14 = inlined_call_operand.vmem [shape: f32[1,128], index: 14, kind: input, shape index: {}]   ;;  %s5780_s15 = inlined_call_operand.hbm [shape: f32[16,128], index: 15, kind: output, shape index: {0}]   ;;  %s5781_s16 = inlined_call_operand.hbm [shape: f32[16,128], index: 16, kind: output, shape index: {1}]  }
   0x1   :  { %5789 = sst [smem:[#allocation24_spill]] %s5765_s0 }
   0x2   :  { %5790 = sst [smem:[#allocation25_spill]] %s5770_s5 }
   0x3   :  { %5791 = sst [smem:[#allocation26_spill]] %s5772_s7 }
   0x4   :  { %5792 = sst [smem:[#allocation27_spill]] %s5778_s13 }
   0x5   :  { %5793 = sst [smem:[#allocation28_spill]] %s5779_s14 }
   0x6   :  { %5794 = sst [smem:[#allocation29_spill]] %s5780_s15 }
   0x7   :  { %22 = vsyncpa [#allocation3], 0 }
   0x8   :  { %23 = vsyncpa [#allocation6], 0 }
   0x9   :  { %24 = vsyncpa [#allocation9], 0 }
   0xa   :  { %25 = vsyncpa [#allocation4], 0 }
   0xb   :  { %27 = vsyncpa [#allocation4 + $0x1], 0 }
   0xc   :  { %28 = vsyncpa [#allocation12], 0 }
   0xd   :  { %30 = vsyncpa [#allocation12 + $0x1], 0  ;;  %s5483_s21 = smov 0   ;;  %s5485_s22 = smov 0  }
   0xe   :  { %s5487_s23 = smov 0   ;;  %s5489_s24 = smov 0  }
   0xf LB: > { %5795 = sst [smem:[#allocation18_spill]] %s5372_s21  ;;  %s5504_s25 = sadd.s32 4294967295, %s5384_s24   ;;  %s5384_s24 = sphi %s5489_s24, %s5814_s24   ;;  %s5380_s23 = sphi %s5487_s23, %s5816_s23   ;;  %s5376_s22 = sphi %s5485_s22, %s5818_s22   ;;  %s5372_s21 = sphi %s5483_s21, %s5817_s21  }
  0x10   : > { %5796 = sst [smem:[#allocation19_spill]] %s5380_s23  ;;  %s3429_s26 = sadd.s32 4294967294, %s5384_s24  }
  0x11   : > { %5797 = sst [smem:[#allocation20_spill]] %s5384_s24  ;;  %s5508_s27 = sadd.s32 1, %s5384_s24  }
  0x12   : > { %5798 = sst [smem:[#allocation21_spill]] %s5508_s27  ;;  %s363_s28 = sadd.s32 1, %s5380_s23 }
  0x13   : > { %s360_s29 = ssub.s32 %s5384_s24, %s5508_s27  ;;  %p373_p0 = scmp.ne.s32.totalorder %s5380_s23, %s5376_s22 }
  0x14   : > { %p361_p1 = scmp.eq.s32.totalorder %s360_s29, 0  ;;  %p374_p2 = scmp.eq.s32.totalorder %s5504_s25, 1 }
  0x15   : > { %p379_p3 = scmp.ne.s32.totalorder %s5376_s22, %s5372_s21  ;;  %p380_p4 = scmp.eq.s32.totalorder %s3429_s26, 1 }
  0x16   : > { %s5519_s30 = scalar_select %p361_p1, %s5380_s23, %s363_s28  }
  0x17   : > { %p5521_p5 = por %p374_p2, %p373_p0  ;;  %p5525_p6 = por %p380_p4, %p379_p3 }
  0x18   : > { %5799 = sst [smem:[#allocation22_spill]] %s5519_s30  ;;  %p3430_p7 = scmp.ge.s32.totalorder %s5384_s24, 1 }
  0x19   : > { %s5801_s17 = scalar_select %p5525_p6, 1, 0 }
  0x1a   : > { %p413_p8 = scmp.lt.s32.totalorder %s5384_s24, 3  ;;  %p5090_p9 = scmp.eq.s32.totalorder %s5504_s25, 0 }
  0x1b   : > { %5802 = sst [smem:[#allocation23_spill]] %s5801_s17  ;;  %s5386_s27 = smov [#allocation5]  }
  0x1c   : > { %p5532_p10 = pnand %p3430_p7, %p413_p8  ;;  %s5804_s7 = sld [smem:[#allocation26_spill]] }
  0x1d   : > { %s5805_s5 = sld [smem:[#allocation25_spill]]  ;;  %s455_s17 = sshll.u32 %s5386_s27, 4  ;;  %s456_s17 = int_to_ptr.vmem [resolvable:$true] %s455_s17 }
  0x1e   : > { %p5070_p11 = pneg %p5532_p10  ;;  %s5387_s19 = smov 256  }
  0x1f   : > { %s5388_s20 = smov 16   ;;  %s487_s14 = sshll.u32 %s5776_s11, 4  ;;  %s488_s14 = int_to_ptr.hbm [resolvable:$true] %s487_s14 }
  0x20   : > { %p5546_p12 = pnand %p5090_p9, %p5070_p11  ;;  %s5390_s15 = smov [#allocation7]  }
  0x21   : > { %s472_s13 = sshll.u32 %s5390_s15, 4  ;;  %s5393_s28 = smov 4   ;;  %s473_s13 = int_to_ptr.vmem [resolvable:$true] %s472_s13 }
  0x22   : > { %s453_s26 = sshll.u32 %s5804_s7, 4  ;;  %s5389_s7 = smov [#allocation2]   ;;  %s454_s26 = int_to_ptr.hbm [resolvable:$true] %s453_s26 }
  0x23   : > { %s436_s30 = sshll.u32 %s5805_s5, 4  ;;  %s438_s21 = sshll.u32 %s5389_s7, 4  ;;  %s437_s30 = int_to_ptr.hbm [resolvable:$true] %s436_s30  ;;  %s439_s21 = int_to_ptr.vmem [resolvable:$true] %s438_s21 }
  0x24   : > { %5076 = dma.hbm_to_vmem [thread:$0]  (!%p5546_p12), %s454_s26, 16384, %s456_s17, [#allocation6], %s5387_s19, %s5387_s19, %s5388_s20  }
  0x25   : > { %s470_s5 = sshll.u32 %s5774_s9, 4  ;;  %s5391_s7 = smov [#allocation8]   ;;  %s471_s5 = int_to_ptr.hbm [resolvable:$true] %s470_s5 }
  0x26   : > { %5073 = dma.hbm_to_vmem [thread:$0]  (!%p5546_p12), %s437_s30, 4096, %s439_s21, [#allocation3], %s5387_s19, %s5387_s19, %s5388_s20  }
  0x27   : > { %5079 = dma.hbm_to_vmem [thread:$0]  (!%p5546_p12), %s471_s5, 16384, %s473_s13, [#allocation6], %s5387_s19, %s5387_s19, %s5388_s20  }
  0x28   : > { %s489_s17 = sshll.u32 %s5391_s7, 4  ;;  %s5392_s26 = smov 64   ;;  %s490_s17 = int_to_ptr.vmem [resolvable:$true] %s489_s17 }
  0x29   : > { %5082 = dma.hbm_to_vmem [thread:$0]  (!%p5546_p12), %s488_s14, 4096, %s490_s17, [#allocation9], %s5392_s26, %s5392_s26, %s5393_s28  }
  0x2a   : > { %521 = sbr.rel (%p5532_p10) target bundleno = 1182 (0x49e), region = 80 }
  0x2f   : > { %5351 = dma.done.wait (%p5090_p9), [#allocation3], 4096  }
  0x30   : > { %5353 = vsyncadd (%p5090_p9), [#allocation3], 4294963200 }
  0x31   : > { %5355 = dma.done.wait (%p5090_p9), [#allocation6], 32768  }
  0x32   : > { %5357 = vsyncadd (%p5090_p9), [#allocation6], 4294934528 }
  0x33   : > { %5359 = dma.done.wait (%p5090_p9), [#allocation9], 4096  }
  0x34   : > { %5361 = vsyncadd (%p5090_p9), [#allocation9], 4294963200  ;;  %p591_p13 = scmp.lt.s32.totalorder %s5504_s25, 1  ;;  %v5394_v0 = vmov 0   ;;  %v5395_v1 = vmov 2   ;;  %s5807_s21 = sld [smem:[#allocation24_spill]] }
  0x35   : > { %5143 = vset.pattern.permute.xlu0 %v5394_v0  ;;  %5145 = vset.pattern.permute.xlu1 %v5395_v1  ;;  %v5396_v3 = vmov 1   ;;  %v5397_v4 = vmov 3   ;;  %v596_v5 = vld [vmem:[%s5766_s1] sm:$0xf]  ;;  %s5590_s20 = sand.u32 1, %s5376_s22   ;;  %s4726_s18 = sshll.u32 %s5504_s25, 3 }
  0x36   : > { %s592_s5 = scalar_select %p591_p13, %s5504_s25, 1  ;;  %v606_v8 = vperm.slane %v596_v5, 0  ;;  %v5148_v9 = vld [vmem:[%s5767_s2] ss:$0 sm:$0xff]  ;;  %v613_v11 = vperm.slane %v596_v5, 1  ;;  %v620_v12 = vperm.slane %v596_v5, 2 }
  0x37   : > { %v627_v13 = vperm.slane %v596_v5, 3  ;;  %s3441_s29 = sshll.u32 %s5590_s20, 3  ;;  %v3558_v24 = vld [vmem:[#allocation2 + $0xe0] sm:$0xf]  ;;  %v4760_v25 = vld [vmem:[#allocation2 + $0xec] sm:$0xf0]  ;;  %s3291_s17 = scalar_lea.hbm %s5781_s16, %s4726_s18 }
  0x38   : > { %s3443_s13 = sshll.u32 %s592_s5, 3  ;;  %s5598_s27 = scalar_lea.vmem [#allocation11], %s3441_s29  ;;  %v4758_v26 = vld [vmem:[#allocation2 + $0xe4] sm:$0xf]  ;;  %v3559_v27 = vor.u32 %v4760_v25, %v3558_v24  ;;  %v3560_v28 = vld [vmem:[#allocation2 + $0xf0] sm:$0xf0] }
  0x39   : > { %v3566_v29 = vld [vmem:[#allocation2 + $0xe8] sm:$0xf]  ;;  %v4761_v30 = vld [vmem:[#allocation2 + $0xf4] sm:$0xf0]  ;;  %v3563_v31 = vor.u32 %v4758_v26, %v3560_v28  ;;  %v4759_v33 = vld [vmem:[#allocation2 + $0xec] sm:$0xf] }
  0x3a   : > { %s594_s23 = scalar_lea.vmem %s5807_s21, %s3443_s13  ;;  %v3567_v32 = vor.u32 %v4761_v30, %v3566_v29  ;;  %v3568_v34 = vld [vmem:[#allocation2 + $0xf8] sm:$0xf0]  ;;  %867 = vmatpush.bf16.msra.mxu0 %v3559_v27  ;;  %v3542_v36 = vld [vmem:[#allocation2 + $0xc0] sm:$0xf]  ;;  %v4756_v37 = vld [vmem:[#allocation2 + $0xcc] sm:$0xf0] }
  0x3b   : > { %v595_v2 = vld [vmem:[%s594_s23] sm:$0xff]  ;;  %v3571_v35 = vor.u32 %v4759_v33, %v3568_v34  ;;  %880 = vmatpush.bf16.msra.mxu1 %v3563_v31  ;;  %v3543_v39 = vor.u32 %v4756_v37, %v3542_v36  ;;  %v3544_v40 = vld [vmem:[#allocation2 + $0xd0] sm:$0xf0]  ;;  %v3550_v41 = vld [vmem:[#allocation2 + $0xc8] sm:$0xf]  ;;  %s3293_s26 = sshll.u32 %s5598_s27, 4  ;;  %s3294_s26 = int_to_ptr.vmem [resolvable:$true] %s3293_s26 }
  0x3c   : > { %603 = vperm.xlu0 %5143, %v595_v2   ;;  %617 = vperm.xlu1 %5145, %v595_v2   ;;  %v4754_v38 = vld [vmem:[#allocation2 + $0xc4] sm:$0xf]  ;;  %v4757_v42 = vld [vmem:[#allocation2 + $0xd4] sm:$0xf0]  ;;  %v4755_v45 = vld [vmem:[#allocation2 + $0xcc] sm:$0xf] }
  0x3d   : > { %893 = vmatpush.bf16.msra.mxu2 %v3567_v32  ;;  %906 = vmatpush.bf16.msra.mxu3 %v3571_v35  ;;  %v3547_v43 = vor.u32 %v4754_v38, %v3544_v40  ;;  %v3551_v44 = vor.u32 %v4757_v42, %v3550_v41  ;;  %v3552_v46 = vld [vmem:[#allocation2 + $0xd8] sm:$0xf0]  ;;  %v3526_v48 = vld [vmem:[#allocation2 + $0xa0] sm:$0xf]  ;;  %v4752_v49 = vld [vmem:[#allocation2 + $0xac] sm:$0xf0] }
  0x3e   : > { %868 = vmatpush.bf16.msra.mxu0 %v3543_v39  ;;  %v3555_v47 = vor.u32 %v4755_v45, %v3552_v46  ;;  %v4750_v50 = vld [vmem:[#allocation2 + $0xa4] sm:$0xf]  ;;  %v3527_v51 = vor.u32 %v4752_v49, %v3526_v48  ;;  %v3528_v52 = vld [vmem:[#allocation2 + $0xb0] sm:$0xf0]  ;;  %v3534_v53 = vld [vmem:[#allocation2 + $0xa8] sm:$0xf] }
  0x3f   : > { %881 = vmatpush.bf16.msra.mxu1 %v3547_v43  ;;  %v4753_v54 = vld [vmem:[#allocation2 + $0xb4] sm:$0xf0]  ;;  %v3531_v55 = vor.u32 %v4750_v50, %v3528_v52  ;;  %v4751_v57 = vld [vmem:[#allocation2 + $0xac] sm:$0xf]  ;;  %v3536_v58 = vld [vmem:[#allocation2 + $0xb8] sm:$0xf0] }
  0x40   : > { %v3535_v56 = vor.u32 %v4753_v54, %v3534_v53  ;;  %v3539_v59 = vor.u32 %v4751_v57, %v3536_v58  ;;  %v3510_v60 = vld [vmem:[#allocation2 + $0x80] sm:$0xf]  ;;  %v4748_v61 = vld [vmem:[#allocation2 + $0x8c] sm:$0xf0]  ;;  %v4746_v62 = vld [vmem:[#allocation2 + $0x84] sm:$0xf] }
  0x41   : > { %894 = vmatpush.bf16.msra.mxu2 %v3551_v44  ;;  %907 = vmatpush.bf16.msra.mxu3 %v3555_v47  ;;  %v3511_v63 = vor.u32 %v4748_v61, %v3510_v60  ;;  %v3512_v0 = vld [vmem:[#allocation2 + $0x90] sm:$0xf0]  ;;  %v3518_v1 = vld [vmem:[#allocation2 + $0x88] sm:$0xf]  ;;  %v4747_v5 = vld [vmem:[#allocation2 + $0x8c] sm:$0xf] }
  0x42   : > { %869 = vmatpush.bf16.msra.mxu0 %v3527_v51  ;;  %v3480_v25 = vld [vmem:[#allocation2 + $0x50] sm:$0xf0]  ;;  %v3486_v26 = vld [vmem:[#allocation2 + $0x48] sm:$0xf]  ;;  %v4741_v27 = vld [vmem:[#allocation2 + $0x54] sm:$0xf0] }
  0x43   : > { %882 = vmatpush.bf16.msra.mxu1 %v3531_v55  ;;  %v3487_v29 = vor.u32 %v4741_v27, %v3486_v26  ;;  %v4739_v30 = vld [vmem:[#allocation2 + $0x4c] sm:$0xf]  ;;  %v3488_v31 = vld [vmem:[#allocation2 + $0x58] sm:$0xf0]  ;;  %v3462_v35 = vld [vmem:[#allocation2 + $0x20] sm:$0xf] }
  0x44   : > { %5144 = vset.pattern.permute.xlu0 %v5396_v3  ;;  %5146 = vset.pattern.permute.xlu1 %v5397_v4  ;;  %v3515_v3 = vor.u32 %v4746_v62, %v3512_v0  ;;  %v3491_v33 = vor.u32 %v4739_v30, %v3488_v31  ;;  %v4736_v36 = vld [vmem:[#allocation2 + $0x2c] sm:$0xf0]  ;;  %v4734_v38 = vld [vmem:[#allocation2 + $0x24] sm:$0xf]  ;;  %v3464_v39 = vld [vmem:[#allocation2 + $0x30] sm:$0xf0] }
  0x45   : > { %610 = vperm.xlu0 %5144, %v595_v2   ;;  %624 = vperm.xlu1 %5146, %v595_v2   ;;  %v4749_v2 = vld [vmem:[#allocation2 + $0x94] sm:$0xf0]  ;;  %v3463_v37 = vor.u32 %v4736_v36, %v3462_v35  ;;  %v3470_v40 = vld [vmem:[#allocation2 + $0x28] sm:$0xf]  ;;  %v3467_v41 = vor.u32 %v4734_v38, %v3464_v39  ;;  %v4735_v43 = vld [vmem:[#allocation2 + $0x2c] sm:$0xf] }
  0x46   : > { %895 = vmatpush.bf16.msra.mxu2 %v3535_v56  ;;  %908 = vmatpush.bf16.msra.mxu3 %v3539_v59  ;;  %v4737_v42 = vld [vmem:[#allocation2 + $0x34] sm:$0xf0]  ;;  %v3472_v44 = vld [vmem:[#allocation2 + $0x38] sm:$0xf0]  ;;  %v3446_v47 = vld [vmem:[#allocation2] sm:$0xf] }
  0x47   : > { %870 = vmatpush.bf16.msra.mxu0 %v3511_v63  ;;  %883 = vmatpush.bf16.msra.mxu1 %v3515_v3  ;;  %v3471_v45 = vor.u32 %v4737_v42, %v3470_v40  ;;  %v3475_v46 = vor.u32 %v4735_v43, %v3472_v44  ;;  %v4732_v48 = vld [vmem:[#allocation2 + $0xc] sm:$0xf0]  ;;  %v4730_v49 = vld [vmem:[#allocation2 + $0x4] sm:$0xf]  ;;  %v3448_v51 = vld [vmem:[#allocation2 + $0x10] sm:$0xf0] }
  0x48   : > { %v3447_v50 = vor.u32 %v4732_v48, %v3446_v47  ;;  %v3454_v52 = vld [vmem:[#allocation2 + $0x8] sm:$0xf]  ;;  %v4733_v53 = vld [vmem:[#allocation2 + $0x14] sm:$0xf0]  ;;  %v3451_v54 = vor.u32 %v4730_v49, %v3448_v51  ;;  %v4731_v56 = vld [vmem:[#allocation2 + $0xc] sm:$0xf] }
  0x49   : > { %v3455_v55 = vor.u32 %v4733_v53, %v3454_v52  ;;  %v3456_v57 = vld [vmem:[#allocation2 + $0x18] sm:$0xf0]  ;;  %v3686_v63 = vld [vmem:[#allocation5 + $0xe0] sm:$0xf]  ;;  %v4792_v0 = vld [vmem:[#allocation5 + $0xec] sm:$0xf0] }
  0x4a   : > { %v3459_v58 = vor.u32 %v4731_v56, %v3456_v57  ;;  %v3687_v3 = vor.u32 %v4792_v0, %v3686_v63  ;;  %v4054_v26 = vld [vmem:[#allocation5 + $0x3c0] sm:$0xf]  ;;  %v4780_v31 = vld [vmem:[#allocation5 + $0x8c] sm:$0xf0]  ;;  %s3295_s28 = sshll.u32 %s3291_s17, 4  ;;  %s3267_s5 = scalar_lea.sflag [#allocation12], %s5590_s20  ;;  %s3296_s28 = int_to_ptr.hbm [resolvable:$true] %s3295_s28 }
  0x4b   : > { %v3638_v30 = vld [vmem:[#allocation5 + $0x80] sm:$0xf]  ;;  %v4812_v36 = vld [vmem:[#allocation5 + $0x18c] sm:$0xf0]  ;;  %s5292_s13 = sshra.s32 %s3296_s28, 4  ;;  %s5298_s23 = scalar_lea.hbm %s5781_s16, 16  ;;  %s5293_s13 = int_to_ptr.hbm [resolvable:$true] %s5292_s13 }
  0x4c   : > { %v3766_v35 = vld [vmem:[#allocation5 + $0x180] sm:$0xf]  ;;  %v4848_v38 = vld [vmem:[#allocation5 + $0x2ac] sm:$0xf0]  ;;  %v3639_v43 = vor.u32 %v4780_v31, %v3638_v30  ;;  %s5294_s14 = scalar_lea.hbm %s5293_s13, 8  ;;  %p5299_p3 = scmp.lt.s32.totalorder %s5293_s13, %s5781_s16 }
  0x4d   : > { %5147 = vset.pattern.permute.xlu0 %v5397_v4  ;;  %v3519_v4 = vor.u32 %v4749_v2, %v3518_v1  ;;  %v3814_v1 = vld [vmem:[#allocation5 + $0x1e0] sm:$0xf]  ;;  %v4880_v40 = vld [vmem:[#allocation5 + $0x3ac] sm:$0xf0]  ;;  %v3767_v49 = vor.u32 %v4812_v36, %v3766_v35  ;;  %v4790_v35 = vld [vmem:[#allocation5 + $0xe4] sm:$0xf]  ;;  %p5295_p0 = scmp.ne.s32.totalorder %s5293_s13, %s5294_s14  ;;  %p5300_p4 = scmp.lt.s32.totalorder %s5298_s23, %s5294_s14 }
  0x4e   : > { %v4038_v39 = vld [vmem:[#allocation5 + $0x3a0] sm:$0xf]  ;;  %v4844_v47 = vld [vmem:[#allocation5 + $0x28c] sm:$0xf0]  ;;  %v3688_v36 = vld [vmem:[#allocation5 + $0xf0] sm:$0xf0] }
  0x4f   : > { %896 = vmatpush.bf16.msra.mxu2 %v3519_v4  ;;  %v4824_v4 = vld [vmem:[#allocation5 + $0x1ec] sm:$0xf0]  ;;  %v4039_v44 = vor.u32 %v4880_v40, %v4038_v39  ;;  %v4022_v51 = vld [vmem:[#allocation5 + $0x380] sm:$0xf]  ;;  %v4822_v39 = vld [vmem:[#allocation5 + $0x1e4] sm:$0xf]  ;;  %p5296_p1 = pnand %p5295_p0, %p5521_p5  ;;  %p5301_p7 = por %p5300_p4, %p5299_p3 }
  0x50   : > { %v4876_v52 = vld [vmem:[#allocation5 + $0x38c] sm:$0xf0]  ;;  %v3750_v53 = vld [vmem:[#allocation5 + $0x160] sm:$0xf]  ;;  %v3816_v40 = vld [vmem:[#allocation5 + $0x1f0] sm:$0xf0] }
  0x51   : > { %v3606_v57 = vld [vmem:[#allocation5 + $0x40] sm:$0xf]  ;;  %v4764_v31 = vld [vmem:[#allocation5 + $0xc] sm:$0xf0]  ;;  %p5297_p2 = pneg %p5296_p1 }
  0x52   : > { %v3574_v30 = vld [vmem:[#allocation5] sm:$0xf] }
  0x53   : > { %p5302_p8 = pnand %p5301_p7, %p5297_p2 }
  0xae   : > { %v604_v6 = vpop.permute.xlu0 %603  ;;  %v618_v7 = vpop.permute.xlu1 %617 }
  0xaf   : > { %v607_v10 = vmul.f32 %v606_v8, %v604_v6  ;;  %v621_v18 = vmul.f32 %v620_v12, %v618_v7  ;;  %v3520_v6 = vld [vmem:[#allocation2 + $0x98] sm:$0xf0]  ;;  %v3494_v8 = vld [vmem:[#allocation2 + $0x60] sm:$0xf]  ;;  %v3496_v12 = vld [vmem:[#allocation2 + $0x70] sm:$0xf0] }
  0xb0   : > { %v3523_v7 = vor.u32 %v4747_v5, %v3520_v6  ;;  %v3670_v5 = vld [vmem:[#allocation5 + $0xc0] sm:$0xf]  ;;  %v3815_v6 = vor.u32 %v4824_v4, %v3814_v1  ;;  %v4804_v4 = vld [vmem:[#allocation5 + $0x14c] sm:$0xf0] }
  0xb1   : > { %v608_v16 = vadd.f32 %v5148_v9, %v607_v10  ;;  %v4744_v9 = vld [vmem:[#allocation2 + $0x6c] sm:$0xf0]  ;;  %v4742_v10 = vld [vmem:[#allocation2 + $0x64] sm:$0xf]  ;;  %v4006_v1 = vld [vmem:[#allocation5 + $0x360] sm:$0xf] }
  0xb2   : > { %909 = vmatpush.bf16.msra.mxu3 %v3523_v7  ;;  %v4788_v7 = vld [vmem:[#allocation5 + $0xcc] sm:$0xf0] }
  0xb7   : > { %v611_v14 = vpop.permute.xlu0 %610  ;;  %v625_v15 = vpop.permute.xlu1 %624 }
  0xb8   : > { %v614_v17 = vmul.f32 %v613_v11, %v611_v14  ;;  %v628_v20 = vmul.f32 %v627_v13, %v625_v15  ;;  %v3495_v11 = vor.u32 %v4744_v9, %v3494_v8  ;;  %v3502_v13 = vld [vmem:[#allocation2 + $0x68] sm:$0xf]  ;;  %v4745_v14 = vld [vmem:[#allocation2 + $0x74] sm:$0xf0]  ;;  %v3499_v15 = vor.u32 %v4742_v10, %v3496_v12  ;;  %v3798_v8 = vld [vmem:[#allocation5 + $0x1c0] sm:$0xf] }
  0xb9   : > { %v4820_v9 = vld [vmem:[#allocation5 + $0x1cc] sm:$0xf0]  ;;  %v3942_v12 = vld [vmem:[#allocation5 + $0x2e0] sm:$0xf] }
  0xba   : > { %v615_v19 = vadd.f32 %v614_v17, %v608_v16  ;;  %v3503_v16 = vor.u32 %v4745_v14, %v3502_v13  ;;  %v4743_v17 = vld [vmem:[#allocation2 + $0x6c] sm:$0xf]  ;;  %871 = vmatpush.bf16.msra.mxu0 %v3495_v11  ;;  %884 = vmatpush.bf16.msra.mxu1 %v3499_v15  ;;  %v3671_v11 = vor.u32 %v4788_v7, %v3670_v5  ;;  %v4856_v13 = vld [vmem:[#allocation5 + $0x2ec] sm:$0xf0]  ;;  %v5149_v7 = vld [vmem:[%s5768_s3] ss:$0 sm:$0xff] }
  0xbb   : > { %v3799_v14 = vor.u32 %v4820_v9, %v3798_v8  ;;  %v3943_v15 = vor.u32 %v4856_v13, %v3942_v12  ;;  %v3862_v12 = vld [vmem:[#allocation5 + $0x240] sm:$0xf]  ;;  %v4836_v13 = vld [vmem:[#allocation5 + $0x24c] sm:$0xf0] }
  0xbc   : > { %v622_v21 = vadd.f32 %v621_v18, %v615_v19  ;;  %v3504_v18 = vld [vmem:[#allocation2 + $0x78] sm:$0xf0]  ;;  %897 = vmatpush.bf16.msra.mxu2 %v3503_v16  ;;  %v4070_v16 = vld [vmem:[#allocation5 + $0x3e0] sm:$0xf] }
  0xbd   : > { %v3507_v19 = vor.u32 %v4743_v17, %v3504_v18  ;;  %v4888_v17 = vld [vmem:[#allocation5 + $0x3ec] sm:$0xf0]  ;;  %v3654_v18 = vld [vmem:[#allocation5 + $0xa0] sm:$0xf] }
  0xbe   : > { %v5593_v22 = vadd.f32 %v628_v20, %v622_v21  ;;  %v3478_v20 = vld [vmem:[#allocation2 + $0x40] sm:$0xf]  ;;  %v4740_v21 = vld [vmem:[#allocation2 + $0x4c] sm:$0xf0] }
  0xbf   : > { %910 = vmatpush.bf16.msra.mxu3 %v3507_v19  ;;  %v3479_v24 = vor.u32 %v4740_v21, %v3478_v20  ;;  %v4071_v19 = vor.u32 %v4888_v17, %v4070_v16  ;;  %v4784_v20 = vld [vmem:[#allocation5 + $0xac] sm:$0xf0]  ;;  %v3782_v21 = vld [vmem:[#allocation5 + $0x1a0] sm:$0xf] }
  0xc0   : > { %633 = vadd.xlane.f32.xlu2 %v5593_v22  ;;  %630 = vst [vmem:[%s5598_s27] sm:$0xff] %v5593_v22  ;;  %v635_v23 = vmul.f32 %v5593_v22, %v5593_v22  ;;  %898 = vmatpush.bf16.msra.mxu2 %v3487_v29  ;;  %v3655_v27 = vor.u32 %v4784_v20, %v3654_v18  ;;  %v4884_v29 = vld [vmem:[#allocation5 + $0x3cc] sm:$0xf0]  ;;  %v3990_v17 = vld [vmem:[#allocation5 + $0x340] sm:$0xf] }
  0xc1   : > { %872 = vmatpush.bf16.msra.mxu0 %v3479_v24  ;;  %v3926_v24 = vld [vmem:[#allocation5 + $0x2c0] sm:$0xf]  ;;  %v4768_v16 = vld [vmem:[#allocation5 + $0x2c] sm:$0xf0] }
  0xc2   : > { %v4868_v18 = vld [vmem:[#allocation5 + $0x34c] sm:$0xf0]  ;;  %v3718_v20 = vld [vmem:[#allocation5 + $0x120] sm:$0xf] }
  0xc3   : > { %911 = vmatpush.bf16.msra.mxu3 %v3491_v33  ;;  %v4055_v33 = vor.u32 %v4884_v29, %v4054_v26  ;;  %v4832_v29 = vld [vmem:[#allocation5 + $0x22c] sm:$0xf0] }
  0xc4   : > { %899 = vmatpush.bf16.msra.mxu2 %v3471_v45  ;;  %v3622_v45 = vld [vmem:[#allocation5 + $0x60] sm:$0xf] }
  0xc5   : > { %873 = vmatpush.bf16.msra.mxu0 %v3463_v37  ;;  %v3910_v37 = vld [vmem:[#allocation5 + $0x2a0] sm:$0xf] }
  0xc7   : > { %912 = vmatpush.bf16.msra.mxu3 %v3475_v46  ;;  %v3894_v46 = vld [vmem:[#allocation5 + $0x280] sm:$0xf] }
  0xc8   : > { %636 = vadd.xlane.f32.xlu2 %v635_v23  ;;  %v4738_v23 = vld [vmem:[#allocation2 + $0x44] sm:$0xf]  ;;  %900 = vmatpush.bf16.msra.mxu2 %v3455_v55  ;;  %v3895_v56 = vor.u32 %v4844_v47, %v3894_v46  ;;  %v3575_v46 = vor.u32 %v4764_v31, %v3574_v30  ;;  %v3752_v30 = vld [vmem:[#allocation5 + $0x170] sm:$0xf0] }
  0xc9   : > { %v3483_v28 = vor.u32 %v4738_v23, %v3480_v25  ;;  %874 = vmatpush.bf16.msra.mxu0 %v3447_v50  ;;  %v4816_v23 = vld [vmem:[#allocation5 + $0x1ac] sm:$0xf0] }
  0xca   : > { %v4852_v25 = vld [vmem:[#allocation5 + $0x2cc] sm:$0xf0] }
  0xcb   : > { %885 = vmatpush.bf16.msra.mxu1 %v3483_v28  ;;  %913 = vmatpush.bf16.msra.mxu3 %v3459_v58  ;;  %v3927_v28 = vor.u32 %v4852_v25, %v3926_v24  ;;  %v4776_v50 = vld [vmem:[#allocation5 + $0x6c] sm:$0xf0]  ;;  %v3863_v24 = vor.u32 %v4836_v13, %v3862_v12  ;;  %v4056_v12 = vld [vmem:[#allocation5 + $0x3d0] sm:$0xf0]  ;;  %v4846_v13 = vld [vmem:[#allocation5 + $0x2a4] sm:$0xf] }
  0xcc   : > { %1731 = vmatpush.bf16.msrb.mxu2 %v3943_v15  ;;  %v3623_v58 = vor.u32 %v4776_v50, %v3622_v45  ;;  %v3691_v50 = vor.u32 %v4790_v35, %v3688_v36  ;;  %v4024_v35 = vld [vmem:[#allocation5 + $0x390] sm:$0xf0] }
  0xcd   : > { %1705 = vmatpush.bf16.msrb.mxu0 %v3687_v3  ;;  %v3734_v3 = vld [vmem:[#allocation5 + $0x140] sm:$0xf] }
  0xce   : > { %v3735_v15 = vor.u32 %v4804_v4, %v3734_v3  ;;  %v4782_v3 = vld [vmem:[#allocation5 + $0xa4] sm:$0xf] }
  0xcf   : > { %886 = vmatpush.bf16.msra.mxu1 %v3467_v41  ;;  %1744 = vmatpush.bf16.msrb.mxu3 %v4071_v19  ;;  %v3911_v41 = vor.u32 %v4848_v38, %v3910_v37 }
  0xd0   : > { %1732 = vmatpush.bf16.msrb.mxu2 %v3927_v28  ;;  %v3846_v28 = vld [vmem:[#allocation5 + $0x220] sm:$0xf] }
  0xd1   : > { %1706 = vmatpush.bf16.msrb.mxu0 %v3671_v11  ;;  %v3590_v11 = vld [vmem:[#allocation5 + $0x20] sm:$0xf]  ;;  %v3847_v37 = vor.u32 %v4832_v29, %v3846_v28  ;;  %v4774_v29 = vld [vmem:[#allocation5 + $0x64] sm:$0xf] }
  0xd2   : > { %v3591_v26 = vor.u32 %v4768_v16, %v3590_v11  ;;  %v4882_v11 = vld [vmem:[#allocation5 + $0x3c4] sm:$0xf] }
  0xd3   : > { %887 = vmatpush.bf16.msra.mxu1 %v3451_v54  ;;  %1745 = vmatpush.bf16.msrb.mxu3 %v4055_v33  ;;  %v4808_v54 = vld [vmem:[#allocation5 + $0x16c] sm:$0xf0] }
  0xd4   : > { %1733 = vmatpush.bf16.msrb.mxu2 %v3911_v41  ;;  %v3751_v0 = vor.u32 %v4808_v54, %v3750_v53  ;;  %v4796_v33 = vld [vmem:[#allocation5 + $0x10c] sm:$0xf0]  ;;  %v3974_v41 = vld [vmem:[#allocation5 + $0x320] sm:$0xf]  ;;  %v3672_v54 = vld [vmem:[#allocation5 + $0xd0] sm:$0xf0] }
  0xd5   : > { %1707 = vmatpush.bf16.msrb.mxu0 %v3655_v27  ;;  %v3991_v27 = vor.u32 %v4868_v18, %v3990_v17  ;;  %v4778_v17 = vld [vmem:[#allocation5 + $0x84] sm:$0xf]  ;;  %v3640_v18 = vld [vmem:[#allocation5 + $0x90] sm:$0xf0] }
  0xd7   : > { %1718 = vmatpush.bf16.msrb.mxu1 %v3815_v6  ;;  %1746 = vmatpush.bf16.msrb.mxu3 %v4039_v44  ;;  %v4828_v44 = vld [vmem:[#allocation5 + $0x20c] sm:$0xf0] }
  0xd8   : > { %1734 = vmatpush.bf16.msrb.mxu2 %v3895_v56  ;;  %v3800_v56 = vld [vmem:[#allocation5 + $0x1d0] sm:$0xf0] }
  0xd9   : > { %1708 = vmatpush.bf16.msrb.mxu0 %v3639_v43  ;;  %v3830_v43 = vld [vmem:[#allocation5 + $0x200] sm:$0xf] }
  0xdb   : > { %1719 = vmatpush.bf16.msrb.mxu1 %v3799_v14 }
  0xdd   : > { %1709 = vmatpush.bf16.msrb.mxu0 %v3623_v58  ;;  %v3958_v58 = vld [vmem:[#allocation5 + $0x300] sm:$0xf] }
 0x133   : > { %v634_v32 = vpop.xlane.xlu2 %633 }
 0x134   : > { %v5604_v34 = vmul.f32 0.0078125, %v634_v32  ;;  %v3783_v32 = vor.u32 %v4816_v23, %v3782_v21  ;;  %v4800_v21 = vld [vmem:[#allocation5 + $0x12c] sm:$0xf0] }
 0x136   : > { %v640_v60 = vmul.f32 %v5604_v34, %v5604_v34  ;;  %1720 = vmatpush.bf16.msrb.mxu1 %v3783_v32  ;;  %v654_v19 = vsub.f32 %v5593_v22, %v5604_v34  ;;  %v3719_v22 = vor.u32 %v4800_v21, %v3718_v20  ;;  %v3702_v32 = vld [vmem:[#allocation5 + $0x100] sm:$0xf]  ;;  %v3768_v20 = vld [vmem:[#allocation5 + $0x190] sm:$0xf0]  ;;  %v4059_v21 = vor.u32 %v4882_v11, %v4056_v12  ;;  %v4826_v12 = vld [vmem:[#allocation5 + $0x204] sm:$0xf] }
 0x137   : > { %v3703_v47 = vor.u32 %v4796_v33, %v3702_v32  ;;  %v4874_v33 = vld [vmem:[#allocation5 + $0x384] sm:$0xf] }
 0x13a   : > { %1721 = vmatpush.bf16.msrb.mxu1 %v3767_v49  ;;  %v3944_v49 = vld [vmem:[#allocation5 + $0x2f0] sm:$0xf0] }
 0x13b   : > { %v637_v59 = vpop.xlane.xlu2 %636 }
 0x13c   : > { %v639_v61 = vmul.f32 0.0078125, %v637_v59  ;;  %v4023_v59 = vor.u32 %v4876_v52, %v4022_v51  ;;  %v3819_v51 = vor.u32 %v4822_v39, %v3816_v40  ;;  %v4786_v52 = vld [vmem:[#allocation5 + $0xc4] sm:$0xf]  ;;  %v3608_v39 = vld [vmem:[#allocation5 + $0x50] sm:$0xf0] }
 0x13d   : > { %v4802_v40 = vld [vmem:[#allocation5 + $0x144] sm:$0xf] }
 0x13e   : > { %v641_v62 = vsub.f32 %v639_v61, %v640_v60  ;;  %v4772_v60 = vld [vmem:[#allocation5 + $0x4c] sm:$0xf0]  ;;  %v3878_v61 = vld [vmem:[#allocation5 + $0x260] sm:$0xf]  ;;  %1747 = vmatpush.bf16.msrb.mxu3 %v4023_v59  ;;  %1722 = vmatpush.bf16.msrb.mxu1 %v3751_v0  ;;  %v3928_v0 = vld [vmem:[#allocation5 + $0x2d0] sm:$0xf0] }
 0x13f   : > { %v3607_v8 = vor.u32 %v4772_v60, %v3606_v57  ;;  %v3831_v57 = vor.u32 %v4828_v44, %v3830_v43  ;;  %v4860_v59 = vld [vmem:[#allocation5 + $0x30c] sm:$0xf0] }
 0x140   : > { %v642_v2 = vmax.f32 %v641_v62, 0.0  ;;  %v4840_v62 = vld [vmem:[#allocation5 + $0x26c] sm:$0xf0]  ;;  %v3959_v4 = vor.u32 %v4860_v59, %v3958_v58  ;;  %v3864_v58 = vld [vmem:[#allocation5 + $0x250] sm:$0xf0] }
 0x141   : > { %v3879_v6 = vor.u32 %v4840_v62, %v3878_v61  ;;  %1710 = vmatpush.bf16.msrb.mxu0 %v3607_v8  ;;  %v4886_v61 = vld [vmem:[#allocation5 + $0x3e4] sm:$0xf]  ;;  %v4072_v62 = vld [vmem:[#allocation5 + $0x3f0] sm:$0xf0] }
 0x142   : > { %v5608_v10 = vadd.f32 1e-05, %v642_v2  ;;  %v4872_v2 = vld [vmem:[#allocation5 + $0x36c] sm:$0xf0]  ;;  %1723 = vmatpush.bf16.msrb.mxu1 %v3735_v15  ;;  %v4075_v8 = vor.u32 %v4886_v61, %v4072_v62  ;;  %v4866_v59 = vld [vmem:[#allocation5 + $0x344] sm:$0xf] }
 0x143   : > { %v4007_v9 = vor.u32 %v4872_v2, %v4006_v1  ;;  %1735 = vmatpush.bf16.msrb.mxu2 %v3879_v6  ;;  %v3675_v1 = vor.u32 %v4786_v52, %v3672_v54  ;;  %v4814_v6 = vld [vmem:[#allocation5 + $0x1a4] sm:$0xf]  ;;  %v3592_v52 = vld [vmem:[#allocation5 + $0x30] sm:$0xf0] }
 0x144   : > { %5154 = vrsqrt.f32 %v5608_v10  ;;  %vm650_vm1 = vweird.f32 %v5608_v10  ;;  %v4798_v54 = vld [vmem:[#allocation5 + $0x124] sm:$0xf]  ;;  %v3992_v61 = vld [vmem:[#allocation5 + $0x350] sm:$0xf0] }
 0x145   : > { %1748 = vmatpush.bf16.msrb.mxu3 %v4007_v9  ;;  %1711 = vmatpush.bf16.msrb.mxu0 %v3591_v26  ;;  %v3896_v26 = vld [vmem:[#allocation5 + $0x290] sm:$0xf0]  ;;  %v3995_v62 = vor.u32 %v4866_v59, %v3992_v61  ;;  %v3934_v61 = vld [vmem:[#allocation5 + $0x2c8] sm:$0xf] }
 0x146   : > { %1724 = vmatpush.bf16.msrb.mxu1 %v3719_v22  ;;  %v3624_v22 = vld [vmem:[#allocation5 + $0x70] sm:$0xf0] }
 0x147   : > { %1736 = vmatpush.bf16.msrb.mxu2 %v3863_v24  ;;  %v4878_v24 = vld [vmem:[#allocation5 + $0x3a4] sm:$0xf]  ;;  %v3627_v36 = vor.u32 %v4774_v29, %v3624_v22 }
 0x149   : > { %1749 = vmatpush.bf16.msrb.mxu3 %v3991_v27  ;;  %1712 = vmatpush.bf16.msrb.mxu0 %v3575_v46  ;;  %v3643_v27 = vor.u32 %v4778_v17, %v3640_v18  ;;  %v3880_v46 = vld [vmem:[#allocation5 + $0x270] sm:$0xf0]  ;;  %v697_v18 = vld [vmem:[%s5771_s6] sm:$0xf] }
 0x14a   : > { %v5155_v42 = vpop.eup %5154  ;;  %1725 = vmatpush.bf16.msrb.mxu1 %v3703_v47  ;;  %v4870_v47 = vld [vmem:[#allocation5 + $0x364] sm:$0xf] }
 0x14b   : > { %v645_v48 = vmul.f32 %v5155_v42, %v5608_v10  ;;  %vm651_vm0 = vweird.f32 %v5155_v42  ;;  %v5150_v10 = vld [vmem:[%s5769_s4] ss:$0 sm:$0xff]  ;;  %1737 = vmatpush.bf16.msrb.mxu2 %v3847_v37 }
 0x14c   : > { %vm652_vm2 = vmor %vm650_vm1, %vm651_vm0 }
 0x14d   : > { %v646_v55 = vmul.f32 %v5155_v42, %v645_v48  ;;  %v4854_v48 = vld [vmem:[#allocation5 + $0x2e4] sm:$0xf] }
 0x14e   : > { %v3947_v60 = vor.u32 %v4854_v48, %v3944_v49  ;;  %v4008_v49 = vld [vmem:[#allocation5 + $0x370] sm:$0xf0] }
 0x14f   : > { %v647_v63 = vmul.f32 0.5, %v646_v55  ;;  %v4818_v55 = vld [vmem:[#allocation5 + $0x1c4] sm:$0xf]  ;;  %1738 = vmatpush.bf16.msrb.mxu2 %v3831_v57 }
 0x150   : > { %v3803_v2 = vor.u32 %v4818_v55, %v3800_v56  ;;  %v3720_v55 = vld [vmem:[#allocation5 + $0x130] sm:$0xf0]  ;;  %v4834_v57 = vld [vmem:[#allocation5 + $0x244] sm:$0xf] }
 0x151   : > { %v648_v5 = vsub.f32 1.5, %v647_v63  ;;  %v4850_v63 = vld [vmem:[#allocation5 + $0x2c4] sm:$0xf]  ;;  %v3723_v56 = vor.u32 %v4798_v54, %v3720_v55  ;;  %v3790_v54 = vld [vmem:[#allocation5 + $0x1a8] sm:$0xf] }
 0x152   : > { %v3931_v9 = vor.u32 %v4850_v63, %v3928_v0  ;;  %v4762_v63 = vld [vmem:[#allocation5 + $0x4] sm:$0xf]  ;;  %v3576_v0 = vld [vmem:[#allocation5 + $0x10] sm:$0xf0]  ;;  %v4817_v55 = vld [vmem:[#allocation5 + $0x1b4] sm:$0xf0] }
 0x153   : > { %v649_v14 = vmul.f32 %v5155_v42, %v648_v5  ;;  %v3656_v5 = vld [vmem:[#allocation5 + $0xb0] sm:$0xf0] }
 0x154   : > { %v3659_v15 = vor.u32 %v4782_v3, %v3656_v5  ;;  %v3704_v3 = vld [vmem:[#allocation5 + $0x110] sm:$0xf0]  ;;  %v4830_v5 = vld [vmem:[#allocation5 + $0x224] sm:$0xf] }
 0x155   : > { %v653_v23 = vsel %vm652_vm2, %v5155_v42, %v649_v14  ;;  %v4864_v42 = vld [vmem:[#allocation5 + $0x32c] sm:$0xf0]  ;;  %v3912_v14 = vld [vmem:[#allocation5 + $0x2b0] sm:$0xf0] }
 0x156   : > { %v655_v25 = vmul.f32 %v654_v19, %v653_v23  ;;  %v3975_v53 = vor.u32 %v4864_v42, %v3974_v41  ;;  %v4810_v19 = vld [vmem:[#allocation5 + $0x184] sm:$0xf]  ;;  %v3915_v23 = vor.u32 %v4846_v13, %v3912_v14  ;;  %v3736_v41 = vld [vmem:[#allocation5 + $0x150] sm:$0xf0]  ;;  %v4027_v42 = vor.u32 %v4874_v33, %v4024_v35  ;;  %v3678_v33 = vld [vmem:[#allocation5 + $0xc8] sm:$0xf] }
 0x157   : > { %v3771_v28 = vor.u32 %v4810_v19, %v3768_v20  ;;  %v3739_v44 = vor.u32 %v4802_v40, %v3736_v41  ;;  %v3832_v13 = vld [vmem:[#allocation5 + $0x210] sm:$0xf0]  ;;  %v699_v19 = vperm.slane %v697_v18, 0  ;;  %v700_v20 = vperm.slane %v697_v18, 1  ;;  %v4789_v35 = vld [vmem:[#allocation5 + $0xd4] sm:$0xf0] }
 0x158   : > { %v659_v34 = vmul.f32 %v5149_v7, %v655_v25  ;;  %1750 = vmatpush.bf16.msrb.mxu3 %v3975_v53  ;;  %v3784_v7 = vld [vmem:[#allocation5 + $0x1b0] sm:$0xf0]  ;;  %v3835_v14 = vor.u32 %v4826_v12, %v3832_v13  ;;  %v3918_v13 = vld [vmem:[#allocation5 + $0x2a8] sm:$0xf] }
 0x159   : > { %v3787_v16 = vor.u32 %v4814_v6, %v3784_v7  ;;  %v4040_v25 = vld [vmem:[#allocation5 + $0x3b0] sm:$0xf0] }
 0x15a   : > { %v663_v38 = vadd.f32 %v5150_v10, %v659_v34  ;;  %v4842_v10 = vld [vmem:[#allocation5 + $0x284] sm:$0xf]  ;;  %v4043_v31 = vor.u32 %v4878_v24, %v4040_v25  ;;  %v3848_v6 = vld [vmem:[#allocation5 + $0x230] sm:$0xf0]  ;;  %v3694_v24 = vld [vmem:[#allocation5 + $0xe8] sm:$0xf] }
 0x15b   : > { %v4806_v34 = vld [vmem:[#allocation5 + $0x164] sm:$0xf]  ;;  %v3899_v32 = vor.u32 %v4842_v10, %v3896_v26  ;;  %v3851_v7 = vor.u32 %v4830_v5, %v3848_v6  ;;  %v4793_v26 = vld [vmem:[#allocation5 + $0xf4] sm:$0xf0]  ;;  %v3774_v6 = vld [vmem:[#allocation5 + $0x188] sm:$0xf] }
 0x15c   : > { %v664_v45 = vpack.c.bf16 %v663_v38, %v663_v38  ;;  %1751 = vmatpush.bf16.msrb.mxu3 %v3959_v4  ;;  %v3755_v37 = vor.u32 %v4806_v34, %v3752_v30  ;;  %v4770_v38 = vld [vmem:[#allocation5 + $0x44] sm:$0xf]  ;;  %v701_v34 = vperm.slane %v697_v18, 2  ;;  %v702_v30 = vperm.slane %v697_v18, 3  ;;  %v4781_v5 = vld [vmem:[#allocation5 + $0x94] sm:$0xf0] }
 0x15d   : > { %v3611_v43 = vor.u32 %v4770_v38, %v3608_v39  ;;  %v3806_v38 = vld [vmem:[#allocation5 + $0x1c8] sm:$0xf]  ;;  %v4821_v39 = vld [vmem:[#allocation5 + $0x1d4] sm:$0xf0] }
 0x15e   : > { %875 = vmatmul.bf16.vlgmr.msra.gmra.mxu0 %v664_v45  ;;  %888 = vmatmul.bf16.vlgmr.msra.gmra.mxu1 %v664_v45  ;;  %v4881_v18 = vld [vmem:[#allocation5 + $0x3b4] sm:$0xf0] }
 0x15f   : > { %901 = vmatmul.bf16.vlgmr.msra.gmra.mxu2 %v664_v45  ;;  %914 = vmatmul.bf16.vlgmr.msra.gmra.mxu3 %v664_v45  ;;  %v4838_v45 = vld [vmem:[#allocation5 + $0x264] sm:$0xf] }
 0x160   : > { %1757 = vmatpush.bf16.msra.mxu0 %v3691_v50  ;;  %1770 = vmatpush.bf16.msra.mxu1 %v3819_v51  ;;  %v3883_v48 = vor.u32 %v4838_v45, %v3880_v46  ;;  %v4011_v50 = vor.u32 %v4870_v47, %v4008_v49  ;;  %v4766_v51 = vld [vmem:[#allocation5 + $0x24] sm:$0xf]  ;;  %v4078_v45 = vld [vmem:[#allocation5 + $0x3e8] sm:$0xf] }
 0x161   : > { %1783 = vmatpush.bf16.msra.mxu2 %v3947_v60  ;;  %1796 = vmatpush.bf16.msra.mxu3 %v4075_v8  ;;  %v3595_v53 = vor.u32 %v4766_v51, %v3592_v52  ;;  %v3867_v60 = vor.u32 %v4834_v57, %v3864_v58  ;;  %v4862_v8 = vld [vmem:[#allocation5 + $0x324] sm:$0xf]  ;;  %v4889_v51 = vld [vmem:[#allocation5 + $0x3f4] sm:$0xf0]  ;;  %v3662_v52 = vld [vmem:[#allocation5 + $0xa8] sm:$0xf] }
 0x162   : > { %v4079_v59 = vor.u32 %v4889_v51, %v4078_v45  ;;  %v4769_v45 = vld [vmem:[#allocation5 + $0x34] sm:$0xf0] }
 0x163   : > { %v4837_v51 = vld [vmem:[#allocation5 + $0x254] sm:$0xf0] }
 0x164   : > { %1758 = vmatpush.bf16.msra.mxu0 %v3675_v1  ;;  %1771 = vmatpush.bf16.msra.mxu1 %v3803_v2  ;;  %v4794_v1 = vld [vmem:[#allocation5 + $0x104] sm:$0xf]  ;;  %v3579_v2 = vor.u32 %v4762_v63, %v3576_v0 }
 0x165   : > { %1784 = vmatpush.bf16.msra.mxu2 %v3931_v9  ;;  %1797 = vmatpush.bf16.msra.mxu3 %v4059_v21  ;;  %v3707_v4 = vor.u32 %v4794_v1, %v3704_v3  ;;  %v3976_v9 = vld [vmem:[#allocation5 + $0x330] sm:$0xf0]  ;;  %v3791_v1 = vor.u32 %v4817_v55, %v3790_v54  ;;  %v4885_v3 = vld [vmem:[#allocation5 + $0x3d4] sm:$0xf0] }
 0x166   : > { %v3979_v11 = vor.u32 %v4862_v8, %v3976_v9 }
 0x168   : > { %1759 = vmatpush.bf16.msra.mxu0 %v3659_v15  ;;  %1772 = vmatpush.bf16.msra.mxu1 %v3787_v16  ;;  %v4858_v15 = vld [vmem:[#allocation5 + $0x304] sm:$0xf]  ;;  %v3960_v16 = vld [vmem:[#allocation5 + $0x310] sm:$0xf0] }
 0x169   : > { %1785 = vmatpush.bf16.msra.mxu2 %v3915_v23  ;;  %1798 = vmatpush.bf16.msra.mxu3 %v4043_v31  ;;  %v3963_v17 = vor.u32 %v4858_v15, %v3960_v16  ;;  %v3695_v31 = vor.u32 %v4793_v26, %v3694_v24  ;;  %v4849_v16 = vld [vmem:[#allocation5 + $0x2b4] sm:$0xf0] }
 0x16a   : > { %v3919_v24 = vor.u32 %v4849_v16, %v3918_v13  ;;  %v4845_v26 = vld [vmem:[#allocation5 + $0x294] sm:$0xf0]  ;;  %v4787_v13 = vld [vmem:[#allocation5 + $0xcc] sm:$0xf] }
 0x16c   : > { %1760 = vmatpush.bf16.msra.mxu0 %v3643_v27  ;;  %1773 = vmatpush.bf16.msra.mxu1 %v3771_v28  ;;  %v3822_v27 = vld [vmem:[#allocation5 + $0x1e8] sm:$0xf]  ;;  %v4825_v28 = vld [vmem:[#allocation5 + $0x1f4] sm:$0xf0] }
 0x16d   : > { %1786 = vmatpush.bf16.msra.mxu2 %v3899_v32  ;;  %1799 = vmatpush.bf16.msra.mxu3 %v4027_v42  ;;  %v3823_v32 = vor.u32 %v4825_v28, %v3822_v27  ;;  %v3679_v42 = vor.u32 %v4789_v35, %v3678_v33  ;;  %v4030_v27 = vld [vmem:[#allocation5 + $0x388] sm:$0xf]  ;;  %v4877_v28 = vld [vmem:[#allocation5 + $0x394] sm:$0xf0] }
 0x16e   : > { %v4031_v35 = vor.u32 %v4877_v28, %v4030_v27 }
 0x170   : > { %1761 = vmatpush.bf16.msra.mxu0 %v3627_v36  ;;  %1774 = vmatpush.bf16.msra.mxu1 %v3755_v37 }
 0x171   : > { %1787 = vmatpush.bf16.msra.mxu2 %v3883_v48  ;;  %1800 = vmatpush.bf16.msra.mxu3 %v4011_v50  ;;  %v3807_v50 = vor.u32 %v4821_v39, %v3806_v38  ;;  %v3886_v38 = vld [vmem:[#allocation5 + $0x268] sm:$0xf]  ;;  %v4841_v39 = vld [vmem:[#allocation5 + $0x274] sm:$0xf0] }
 0x174   : > { %1762 = vmatpush.bf16.msra.mxu0 %v3611_v43  ;;  %1775 = vmatpush.bf16.msra.mxu1 %v3739_v44  ;;  %v3950_v43 = vld [vmem:[#allocation5 + $0x2e8] sm:$0xf]  ;;  %v4857_v44 = vld [vmem:[#allocation5 + $0x2f4] sm:$0xf0] }
 0x175   : > { %1788 = vmatpush.bf16.msra.mxu2 %v3867_v60  ;;  %1801 = vmatpush.bf16.msra.mxu3 %v3995_v62  ;;  %v3951_v58 = vor.u32 %v4857_v44, %v3950_v43  ;;  %v4853_v62 = vld [vmem:[#allocation5 + $0x2d4] sm:$0xf0]  ;;  %v3598_v44 = vld [vmem:[#allocation5 + $0x28] sm:$0xf] }
 0x176   : > { %v3599_v54 = vor.u32 %v4769_v45, %v3598_v44  ;;  %v4779_v44 = vld [vmem:[#allocation5 + $0x8c] sm:$0xf]  ;;  %v3648_v45 = vld [vmem:[#allocation5 + $0x98] sm:$0xf0] }
 0x178   : > { %1763 = vmatpush.bf16.msra.mxu0 %v3595_v53  ;;  %1776 = vmatpush.bf16.msra.mxu1 %v3723_v56  ;;  %v4785_v53 = vld [vmem:[#allocation5 + $0xb4] sm:$0xf0] }
 0x179   : > { %1789 = vmatpush.bf16.msra.mxu2 %v3851_v7  ;;  %1802 = vmatpush.bf16.msra.mxu3 %v3979_v11  ;;  %v3663_v60 = vor.u32 %v4785_v53, %v3662_v52  ;;  %v4813_v7 = vld [vmem:[#allocation5 + $0x194] sm:$0xf0]  ;;  %v3935_v11 = vor.u32 %v4853_v62, %v3934_v61  ;;  %v3998_v52 = vld [vmem:[#allocation5 + $0x348] sm:$0xf]  ;;  %v3696_v61 = vld [vmem:[#allocation5 + $0xf8] sm:$0xf0] }
 0x17a   : > { %v3775_v15 = vor.u32 %v4813_v7, %v3774_v6  ;;  %v4869_v53 = vld [vmem:[#allocation5 + $0x354] sm:$0xf0]  ;;  %v3982_v6 = vld [vmem:[#allocation5 + $0x328] sm:$0xf] }
 0x17b   : > { %v4865_v7 = vld [vmem:[#allocation5 + $0x334] sm:$0xf0] }
 0x17c   : > { %1764 = vmatpush.bf16.msra.mxu0 %v3579_v2  ;;  %1777 = vmatpush.bf16.msra.mxu1 %v3707_v4  ;;  %v4062_v2 = vld [vmem:[#allocation5 + $0x3c8] sm:$0xf] }
 0x17d   : > { %1790 = vmatpush.bf16.msra.mxu2 %v3835_v14  ;;  %1803 = vmatpush.bf16.msra.mxu3 %v3963_v17  ;;  %v3646_v4 = vld [vmem:[#allocation5 + $0x88] sm:$0xf]  ;;  %v4063_v12 = vor.u32 %v4885_v3, %v4062_v2  ;;  %v4823_v2 = vld [vmem:[#allocation5 + $0x1ec] sm:$0xf]  ;;  %v3824_v3 = vld [vmem:[#allocation5 + $0x1f8] sm:$0xf0] }
 0x17e   : > { %v3647_v14 = vor.u32 %v4781_v5, %v3646_v4  ;;  %v4046_v17 = vld [vmem:[#allocation5 + $0x3a8] sm:$0xf]  ;;  %v4833_v5 = vld [vmem:[#allocation5 + $0x234] sm:$0xf0] }
 0x17f   : > { %v3854_v4 = vld [vmem:[#allocation5 + $0x228] sm:$0xf] }
 0x180   : > { %v3855_v16 = vor.u32 %v4833_v5, %v3854_v4 }
 0x1db   : > { %v876_v21 = vpop.f32.mrf.mxu0  ;;  %v889_v23 = vpop.f32.mrf.mxu1 }
 0x1dc   : > { %v877_v25 = vadd.f32 %v876_v21, %v699_v19  ;;  %v890_v10 = vadd.f32 %v889_v23, %v700_v20  ;;  %v3630_v19 = vld [vmem:[#allocation5 + $0x68] sm:$0xf]  ;;  %v4777_v20 = vld [vmem:[#allocation5 + $0x74] sm:$0xf0] }
 0x1dd   : > { %v3758_v21 = vld [vmem:[#allocation5 + $0x168] sm:$0xf]  ;;  %v4809_v23 = vld [vmem:[#allocation5 + $0x174] sm:$0xf0] }
 0x1de   : > { %v919_v29 = vmax.f32 %v877_v25, 0.0  ;;  %v920_v22 = vmax.f32 %v890_v10, 0.0  ;;  %v4047_v25 = vor.u32 %v4881_v18, %v4046_v17  ;;  %v3902_v10 = vld [vmem:[#allocation5 + $0x288] sm:$0xf]  ;;  %v3983_v17 = vor.u32 %v4865_v7, %v3982_v6  ;;  %v3808_v18 = vld [vmem:[#allocation5 + $0x1d8] sm:$0xf0] }
 0x1df   : > { %v3903_v33 = vor.u32 %v4845_v26, %v3902_v10  ;;  %v4887_v10 = vld [vmem:[#allocation5 + $0x3ec] sm:$0xf]  ;;  %v4080_v26 = vld [vmem:[#allocation5 + $0x3f8] sm:$0xf0] }
 0x1e0   : > { %v5625_v36 = vpack.c.bf16 %v919_v29, %v919_v29  ;;  %v5627_v37 = vpack.c.bf16 %v920_v22, %v920_v22  ;;  %v3631_v29 = vor.u32 %v4777_v20, %v3630_v19  ;;  %v3759_v22 = vor.u32 %v4809_v23, %v3758_v21  ;;  %v3838_v19 = vld [vmem:[#allocation5 + $0x208] sm:$0xf]  ;;  %v4829_v20 = vld [vmem:[#allocation5 + $0x214] sm:$0xf0]  ;;  %v4771_v6 = vld [vmem:[#allocation5 + $0x4c] sm:$0xf] }
 0x1e1   : > { %v3966_v21 = vld [vmem:[#allocation5 + $0x308] sm:$0xf]  ;;  %v4861_v23 = vld [vmem:[#allocation5 + $0x314] sm:$0xf0]  ;;  %v3616_v7 = vld [vmem:[#allocation5 + $0x58] sm:$0xf0] }
 0x1e2   : > { %v902_v40 = vpop.f32.mrf.mxu2  ;;  %v915_v41 = vpop.f32.mrf.mxu3  ;;  %1713 = vmatmul.bf16.vlgmr.msrb.gmra.mxu0 %v5625_v36  ;;  %1726 = vmatmul.bf16.vlgmr.msrb.gmra.mxu1 %v5627_v37 }
 0x1e3   : > { %v903_v46 = vadd.f32 %v902_v40, %v701_v34  ;;  %v916_v47 = vadd.f32 %v915_v41, %v702_v30  ;;  %1809 = vmatpush.bf16.msrb.mxu0 %v3695_v31  ;;  %1822 = vmatpush.bf16.msrb.mxu1 %v3823_v32  ;;  %v878_v48 = vpop.f32.mrf.mxu0  ;;  %v891_v49 = vpop.f32.mrf.mxu1  ;;  %v3614_v34 = vld [vmem:[#allocation5 + $0x48] sm:$0xf]  ;;  %v4773_v30 = vld [vmem:[#allocation5 + $0x54] sm:$0xf0] }
 0x1e4   : > { %v3742_v31 = vld [vmem:[#allocation5 + $0x148] sm:$0xf]  ;;  %v4805_v32 = vld [vmem:[#allocation5 + $0x154] sm:$0xf0]  ;;  %v3887_v48 = vor.u32 %v4841_v39, %v3886_v38  ;;  %v4851_v38 = vld [vmem:[#allocation5 + $0x2cc] sm:$0xf] }
 0x1e5   : > { %v921_v56 = vmax.f32 %v903_v46, 0.0  ;;  %v922_v57 = vmax.f32 %v916_v47, 0.0  ;;  %v4014_v40 = vld [vmem:[#allocation5 + $0x368] sm:$0xf]  ;;  %v4873_v41 = vld [vmem:[#allocation5 + $0x374] sm:$0xf0]  ;;  %v3743_v43 = vor.u32 %v4805_v32, %v3742_v31 }
 0x1e6   : > { %v3726_v46 = vld [vmem:[#allocation5 + $0x128] sm:$0xf]  ;;  %v4801_v47 = vld [vmem:[#allocation5 + $0x134] sm:$0xf0]  ;;  %v4015_v49 = vor.u32 %v4873_v41, %v4014_v40  ;;  %v4815_v31 = vld [vmem:[#allocation5 + $0x1ac] sm:$0xf] }
 0x1e7   : > { %v5631_v63 = vpack.c.bf16 %v921_v56, %v921_v56  ;;  %v5633_v0 = vpack.c.bf16 %v922_v57, %v922_v57  ;;  %1810 = vmatpush.bf16.msrb.mxu0 %v3679_v42  ;;  %1823 = vmatpush.bf16.msrb.mxu1 %v3807_v50  ;;  %v3615_v42 = vor.u32 %v4773_v30, %v3614_v34  ;;  %v3870_v50 = vld [vmem:[#allocation5 + $0x248] sm:$0xf]  ;;  %v4765_v57 = vld [vmem:[#allocation5 + $0x14] sm:$0xf0]  ;;  %v3664_v30 = vld [vmem:[#allocation5 + $0xb8] sm:$0xf0] }
 0x1e8   : > { %v3727_v55 = vor.u32 %v4801_v47, %v3726_v46  ;;  %v3582_v56 = vld [vmem:[#allocation5 + $0x8] sm:$0xf]  ;;  %v3871_v62 = vor.u32 %v4837_v51, %v3870_v50  ;;  %v3967_v34 = vor.u32 %v4861_v23, %v3966_v21  ;;  %v3792_v32 = vld [vmem:[#allocation5 + $0x1b8] sm:$0xf0]  ;;  %v4883_v40 = vld [vmem:[#allocation5 + $0x3cc] sm:$0xf] }
 0x1e9   : > { %1739 = vmatmul.bf16.vlgmr.msrb.gmra.mxu2 %v5631_v63  ;;  %1752 = vmatmul.bf16.vlgmr.msrb.gmra.mxu3 %v5633_v0  ;;  %v3936_v39 = vld [vmem:[#allocation5 + $0x2d8] sm:$0xf0]  ;;  %v4811_v46 = vld [vmem:[#allocation5 + $0x18c] sm:$0xf] }
 0x1ea   : > { %1835 = vmatpush.bf16.msrb.mxu2 %v3951_v58  ;;  %1848 = vmatpush.bf16.msrb.mxu3 %v4079_v59  ;;  %v904_v8 = vpop.f32.mrf.mxu2  ;;  %v917_v9 = vpop.f32.mrf.mxu3  ;;  %v3710_v58 = vld [vmem:[#allocation5 + $0x108] sm:$0xf]  ;;  %v4797_v59 = vld [vmem:[#allocation5 + $0x114] sm:$0xf0]  ;;  %v4064_v41 = vld [vmem:[#allocation5 + $0x3d8] sm:$0xf0] }
 0x1eb   : > { %1811 = vmatpush.bf16.msrb.mxu0 %v3663_v60  ;;  %1824 = vmatpush.bf16.msrb.mxu1 %v3791_v1  ;;  %v4791_v60 = vld [vmem:[#allocation5 + $0xec] sm:$0xf]  ;;  %v3999_v1 = vor.u32 %v4869_v53, %v3998_v52  ;;  %v3583_v8 = vor.u32 %v4765_v57, %v3582_v56  ;;  %v3711_v9 = vor.u32 %v4797_v59, %v3710_v58  ;;  %v3776_v47 = vld [vmem:[#allocation5 + $0x198] sm:$0xf0] }
 0x1ec   : > { %v4847_v50 = vld [vmem:[#allocation5 + $0x2ac] sm:$0xf]  ;;  %v3920_v51 = vld [vmem:[#allocation5 + $0x2b8] sm:$0xf0] }
 0x1ed   : > { %v4879_v52 = vld [vmem:[#allocation5 + $0x3ac] sm:$0xf]  ;;  %v4048_v53 = vld [vmem:[#allocation5 + $0x3b8] sm:$0xf0] }
 0x1ee   : > { %1836 = vmatpush.bf16.msrb.mxu2 %v3935_v11  ;;  %1849 = vmatpush.bf16.msrb.mxu3 %v4063_v12  ;;  %v3699_v11 = vor.u32 %v4791_v60, %v3696_v61  ;;  %v3827_v12 = vor.u32 %v4823_v2, %v3824_v3  ;;  %v4775_v56 = vld [vmem:[#allocation5 + $0x6c] sm:$0xf]  ;;  %v3632_v57 = vld [vmem:[#allocation5 + $0x78] sm:$0xf0]  ;;  %v3923_v60 = vor.u32 %v4847_v50, %v3920_v51  ;;  %v4182_v50 = vld [vmem:[#allocation7 + $0xc0] sm:$0xf] }
 0x1ef   : > { %1812 = vmatpush.bf16.msrb.mxu0 %v3647_v14  ;;  %1825 = vmatpush.bf16.msrb.mxu1 %v3775_v15  ;;  %v3680_v14 = vld [vmem:[#allocation5 + $0xd8] sm:$0xf0]  ;;  %v4819_v15 = vld [vmem:[#allocation5 + $0x1cc] sm:$0xf]  ;;  %v4051_v61 = vor.u32 %v4879_v52, %v4048_v53  ;;  %v3635_v4 = vor.u32 %v4775_v56, %v3632_v57  ;;  %v4948_v56 = vld [vmem:[#allocation7 + $0x1cc] sm:$0xf0] }
 0x1f0   : > { %v3683_v27 = vor.u32 %v4787_v13, %v3680_v14  ;;  %v3811_v28 = vor.u32 %v4819_v15, %v3808_v18  ;;  %v4807_v58 = vld [vmem:[#allocation5 + $0x16c] sm:$0xf]  ;;  %v3760_v59 = vld [vmem:[#allocation5 + $0x178] sm:$0xf0] }
 0x1f1   : > { %v4875_v2 = vld [vmem:[#allocation5 + $0x38c] sm:$0xf]  ;;  %v4032_v3 = vld [vmem:[#allocation5 + $0x398] sm:$0xf0]  ;;  %v3763_v5 = vor.u32 %v4807_v58, %v3760_v59 }
 0x1f2   : > { %1837 = vmatpush.bf16.msrb.mxu2 %v3919_v24  ;;  %1850 = vmatpush.bf16.msrb.mxu3 %v4047_v25  ;;  %v4855_v24 = vld [vmem:[#allocation5 + $0x2ec] sm:$0xf]  ;;  %v3952_v25 = vld [vmem:[#allocation5 + $0x2f8] sm:$0xf0] }
 0x1f3   : > { %1765 = vmatmul.bf16.vlgmr.msra.gmra.mxu0 %v5625_v36  ;;  %1778 = vmatmul.bf16.vlgmr.msra.gmra.mxu1 %v5627_v37  ;;  %v4839_v13 = vld [vmem:[#allocation5 + $0x26c] sm:$0xf]  ;;  %v3888_v14 = vld [vmem:[#allocation5 + $0x278] sm:$0xf0] }
 0x1f4   : > { %1813 = vmatpush.bf16.msrb.mxu0 %v3631_v29  ;;  %1826 = vmatpush.bf16.msrb.mxu1 %v3759_v22  ;;  %v4783_v29 = vld [vmem:[#allocation5 + $0xac] sm:$0xf]  ;;  %v3839_v22 = vor.u32 %v4829_v20, %v3838_v19  ;;  %v3600_v20 = vld [vmem:[#allocation5 + $0x38] sm:$0xf0] }
 0x1f5   : > { %v4871_v15 = vld [vmem:[#allocation5 + $0x36c] sm:$0xf]  ;;  %v3728_v23 = vld [vmem:[#allocation5 + $0x138] sm:$0xf0] }
 0x1f6   : > { %1838 = vmatpush.bf16.msrb.mxu2 %v3903_v33  ;;  %1851 = vmatpush.bf16.msrb.mxu3 %v4031_v35  ;;  %v3955_v33 = vor.u32 %v4855_v24, %v3952_v25  ;;  %v4083_v35 = vor.u32 %v4887_v10, %v4080_v26  ;;  %v4767_v19 = vld [vmem:[#allocation5 + $0x2c] sm:$0xf]  ;;  %v3891_v24 = vor.u32 %v4839_v13, %v3888_v14  ;;  %v3872_v26 = vld [vmem:[#allocation5 + $0x258] sm:$0xf0]  ;;  %v4150_v13 = vld [vmem:[#allocation7 + $0x80] sm:$0xf] }
 0x1f7   : > { %v4799_v21 = vld [vmem:[#allocation5 + $0x12c] sm:$0xf]  ;;  %v3840_v57 = vld [vmem:[#allocation5 + $0x218] sm:$0xf0] }
 0x1f8   : > { %1814 = vmatpush.bf16.msrb.mxu0 %v3615_v42  ;;  %1827 = vmatpush.bf16.msrb.mxu1 %v3743_v43  ;;  %v3667_v42 = vor.u32 %v4783_v29, %v3664_v30  ;;  %v3795_v43 = vor.u32 %v4815_v31, %v3792_v32  ;;  %v4835_v10 = vld [vmem:[#allocation5 + $0x24c] sm:$0xf]  ;;  %v3603_v29 = vor.u32 %v4767_v19, %v3600_v20  ;;  %v3584_v30 = vld [vmem:[#allocation5 + $0x18] sm:$0xf0]  ;;  %v4904_v20 = vld [vmem:[#allocation7 + $0x6c] sm:$0xf0] }
 0x1f9   : > { %1791 = vmatmul.bf16.vlgmr.msra.gmra.mxu2 %v5631_v63  ;;  %1804 = vmatmul.bf16.vlgmr.msra.gmra.mxu3 %v5633_v0  ;;  %v4795_v31 = vld [vmem:[#allocation5 + $0x10c] sm:$0xf]  ;;  %v3712_v32 = vld [vmem:[#allocation5 + $0x118] sm:$0xf0] }
 0x1fa   : > { %1839 = vmatpush.bf16.msrb.mxu2 %v3887_v48  ;;  %1852 = vmatpush.bf16.msrb.mxu3 %v4015_v49  ;;  %v3939_v48 = vor.u32 %v4851_v38, %v3936_v39  ;;  %v4067_v49 = vor.u32 %v4883_v40, %v4064_v41  ;;  %v3875_v38 = vor.u32 %v4835_v10, %v3872_v26  ;;  %v4920_v40 = vld [vmem:[#allocation7 + $0xec] sm:$0xf0]  ;;  %v4326_v41 = vld [vmem:[#allocation7 + $0x1e0] sm:$0xf]  ;;  %v4859_v58 = vld [vmem:[#allocation5 + $0x30c] sm:$0xf] }
 0x1fb   : > { %v3968_v59 = vld [vmem:[#allocation5 + $0x318] sm:$0xf0]  ;;  %v4900_v26 = vld [vmem:[#allocation7 + $0x4c] sm:$0xf0] }
 0x1fc   : > { %1815 = vmatpush.bf16.msrb.mxu0 %v3599_v54  ;;  %1828 = vmatpush.bf16.msrb.mxu1 %v3727_v55  ;;  %v3651_v54 = vor.u32 %v4779_v44, %v3648_v45  ;;  %v3779_v55 = vor.u32 %v4811_v46, %v3776_v47  ;;  %v4863_v44 = vld [vmem:[#allocation5 + $0x32c] sm:$0xf]  ;;  %v3984_v45 = vld [vmem:[#allocation5 + $0x338] sm:$0xf0]  ;;  %v3715_v47 = vor.u32 %v4795_v31, %v3712_v32  ;;  %v4892_v31 = vld [vmem:[#allocation7 + $0xc] sm:$0xf0] }
 0x1fd   : > { %v3987_v53 = vor.u32 %v4863_v44, %v3984_v45  ;;  %v4918_v32 = vld [vmem:[#allocation7 + $0xe4] sm:$0xf]  ;;  %v4230_v45 = vld [vmem:[#allocation7 + $0x120] sm:$0xf] }
 0x1fe   : > { %1840 = vmatpush.bf16.msrb.mxu2 %v3871_v62  ;;  %1853 = vmatpush.bf16.msrb.mxu3 %v3999_v1  ;;  %v4843_v62 = vld [vmem:[#allocation5 + $0x28c] sm:$0xf]  ;;  %v3904_v1 = vld [vmem:[#allocation5 + $0x298] sm:$0xf0] }
 0x200   : > { %1816 = vmatpush.bf16.msrb.mxu0 %v3583_v8  ;;  %1829 = vmatpush.bf16.msrb.mxu1 %v3711_v9  ;;  %v4803_v8 = vld [vmem:[#allocation5 + $0x14c] sm:$0xf]  ;;  %v3744_v9 = vld [vmem:[#allocation5 + $0x158] sm:$0xf0] }
 0x201   : > { %v3747_v18 = vor.u32 %v4803_v8, %v3744_v9  ;;  %v4438_v9 = vld [vmem:[#allocation7 + $0x2c0] sm:$0xf] }
 0x202   : > { %1841 = vmatpush.bf16.msrb.mxu2 %v3855_v16  ;;  %1854 = vmatpush.bf16.msrb.mxu3 %v3983_v17  ;;  %v4016_v16 = vld [vmem:[#allocation5 + $0x378] sm:$0xf0]  ;;  %v3619_v17 = vor.u32 %v4771_v6, %v3616_v7  ;;  %v4294_v6 = vld [vmem:[#allocation7 + $0x1a0] sm:$0xf]  ;;  %v4944_v7 = vld [vmem:[#allocation7 + $0x1ac] sm:$0xf0] }
 0x203   : > { %1817 = vmatmul.bf16.vlgmr.msrb.gmra.mxu0 %v5625_v36  ;;  %1830 = vmatmul.bf16.vlgmr.msrb.gmra.mxu1 %v5627_v37  ;;  %v4019_v25 = vor.u32 %v4871_v15, %v4016_v16  ;;  %v4295_v14 = vor.u32 %v4944_v7, %v4294_v6  ;;  %v4908_v15 = vld [vmem:[#allocation7 + $0x8c] sm:$0xf0]  ;;  %v4278_v16 = vld [vmem:[#allocation7 + $0x180] sm:$0xf]  ;;  %v4898_v7 = vld [vmem:[#allocation7 + $0x44] sm:$0xf] }
 0x204   : > { %1861 = vmatpush.bf16.msra.mxu0 %v3699_v11  ;;  %1874 = vmatpush.bf16.msra.mxu1 %v3827_v12  ;;  %v3907_v11 = vor.u32 %v4843_v62, %v3904_v1  ;;  %v4035_v12 = vor.u32 %v4875_v2, %v4032_v3  ;;  %v3971_v3 = vor.u32 %v4859_v58, %v3968_v59  ;;  %v4972_v58 = vld [vmem:[#allocation7 + $0x28c] sm:$0xf0] }
 0x206   : > { %1842 = vmatpush.bf16.msrb.mxu2 %v3839_v22  ;;  %1855 = vmatpush.bf16.msrb.mxu3 %v3967_v34  ;;  %v3731_v22 = vor.u32 %v4799_v21, %v3728_v23  ;;  %v4763_v34 = vld [vmem:[#allocation5 + $0xc] sm:$0xf]  ;;  %v4262_v21 = vld [vmem:[#allocation7 + $0x160] sm:$0xf]  ;;  %v4936_v23 = vld [vmem:[#allocation7 + $0x16c] sm:$0xf0] }
 0x207   : > { %v3587_v46 = vor.u32 %v4763_v34, %v3584_v30  ;;  %v4263_v10 = vor.u32 %v4936_v23, %v4262_v21  ;;  %v4086_v30 = vld [vmem:[#allocation7] sm:$0xf]  ;;  %v4960_v23 = vld [vmem:[#allocation7 + $0x22c] sm:$0xf0] }
 0x208   : > { %1862 = vmatpush.bf16.msra.mxu0 %v3683_v27  ;;  %1875 = vmatpush.bf16.msra.mxu1 %v3811_v28  ;;  %v4867_v27 = vld [vmem:[#allocation5 + $0x34c] sm:$0xf]  ;;  %v4000_v28 = vld [vmem:[#allocation5 + $0x358] sm:$0xf0]  ;;  %v4358_v21 = vld [vmem:[#allocation7 + $0x220] sm:$0xf] }
 0x209   : > { %1843 = vmatmul.bf16.vlgmr.msrb.gmra.mxu2 %v5631_v63  ;;  %1856 = vmatmul.bf16.vlgmr.msrb.gmra.mxu3 %v5633_v0  ;;  %v4003_v39 = vor.u32 %v4867_v27, %v4000_v28  ;;  %v4246_v27 = vld [vmem:[#allocation7 + $0x140] sm:$0xf]  ;;  %v4932_v28 = vld [vmem:[#allocation7 + $0x14c] sm:$0xf0] }
 0x20a   : > { %1887 = vmatpush.bf16.msra.mxu2 %v3955_v33  ;;  %1900 = vmatpush.bf16.msra.mxu3 %v4083_v35  ;;  %v4831_v33 = vld [vmem:[#allocation5 + $0x22c] sm:$0xf]  ;;  %v4198_v35 = vld [vmem:[#allocation7 + $0xe0] sm:$0xf] }
 0x20c   : > { %1863 = vmatpush.bf16.msra.mxu0 %v3667_v42  ;;  %1876 = vmatpush.bf16.msra.mxu1 %v3795_v43  ;;  %v4952_v42 = vld [vmem:[#allocation7 + $0x1ec] sm:$0xf0]  ;;  %v3856_v43 = vld [vmem:[#allocation5 + $0x238] sm:$0xf0] }
 0x20d   : > { %v4327_v51 = vor.u32 %v4952_v42, %v4326_v41  ;;  %v3859_v52 = vor.u32 %v4831_v33, %v3856_v43  ;;  %v4200_v33 = vld [vmem:[#allocation7 + $0xf0] sm:$0xf0]  ;;  %v4910_v42 = vld [vmem:[#allocation7 + $0xa4] sm:$0xf] }
 0x20e   : > { %1888 = vmatpush.bf16.msra.mxu2 %v3939_v48  ;;  %1901 = vmatpush.bf16.msra.mxu3 %v4067_v49  ;;  %v4827_v48 = vld [vmem:[#allocation5 + $0x20c] sm:$0xf]  ;;  %v4199_v49 = vor.u32 %v4920_v40, %v4198_v35  ;;  %v4087_v35 = vor.u32 %v4892_v31, %v4086_v30  ;;  %v4184_v40 = vld [vmem:[#allocation7 + $0xd0] sm:$0xf0]  ;;  %v5016_v30 = vld [vmem:[#allocation7 + $0x3ec] sm:$0xf0] }
 0x20f   : > { %v3843_v2 = vor.u32 %v4827_v48, %v3840_v57  ;;  %v4168_v43 = vld [vmem:[#allocation7 + $0xb0] sm:$0xf0]  ;;  %v4934_v31 = vld [vmem:[#allocation7 + $0x164] sm:$0xf] }
 0x210   : > { %1864 = vmatpush.bf16.msra.mxu0 %v3651_v54  ;;  %1877 = vmatpush.bf16.msra.mxu1 %v3779_v55  ;;  %v4916_v54 = vld [vmem:[#allocation7 + $0xcc] sm:$0xf0]  ;;  %v4310_v55 = vld [vmem:[#allocation7 + $0x1c0] sm:$0xf]  ;;  %v4171_v44 = vor.u32 %v4910_v42, %v4168_v43 }
 0x211   : > { %v4183_v62 = vor.u32 %v4916_v54, %v4182_v50  ;;  %v4311_v1 = vor.u32 %v4948_v56, %v4310_v55  ;;  %v4906_v50 = vld [vmem:[#allocation7 + $0x84] sm:$0xf]  ;;  %v4924_v54 = vld [vmem:[#allocation7 + $0x10c] sm:$0xf0]  ;;  %v4406_v55 = vld [vmem:[#allocation7 + $0x280] sm:$0xf] }
 0x212   : > { %1889 = vmatpush.bf16.msra.mxu2 %v3923_v60  ;;  %1902 = vmatpush.bf16.msra.mxu3 %v4051_v61  ;;  %v4454_v60 = vld [vmem:[#allocation7 + $0x2e0] sm:$0xf]  ;;  %v4984_v61 = vld [vmem:[#allocation7 + $0x2ec] sm:$0xf0]  ;;  %v4407_v59 = vor.u32 %v4972_v58, %v4406_v55  ;;  %v4974_v55 = vld [vmem:[#allocation7 + $0x2a4] sm:$0xf] }
 0x213   : > { %v4455_v8 = vor.u32 %v4984_v61, %v4454_v60  ;;  %v4902_v60 = vld [vmem:[#allocation7 + $0x64] sm:$0xf]  ;;  %v4136_v61 = vld [vmem:[#allocation7 + $0x70] sm:$0xf0]  ;;  %v5012_v42 = vld [vmem:[#allocation7 + $0x3cc] sm:$0xf0] }
 0x214   : > { %1865 = vmatpush.bf16.msra.mxu0 %v3635_v4  ;;  %1878 = vmatpush.bf16.msra.mxu1 %v3763_v5  ;;  %v4166_v4 = vld [vmem:[#allocation7 + $0xa0] sm:$0xf]  ;;  %v4912_v5 = vld [vmem:[#allocation7 + $0xac] sm:$0xf0] }
 0x216   : > { %1890 = vmatpush.bf16.msra.mxu2 %v3907_v11  ;;  %1903 = vmatpush.bf16.msra.mxu3 %v4035_v12  ;;  %v4980_v11 = vld [vmem:[#allocation7 + $0x2cc] sm:$0xf0]  ;;  %v4167_v12 = vor.u32 %v4912_v5, %v4166_v4  ;;  %v4139_v4 = vor.u32 %v4902_v60, %v4136_v61  ;;  %v5652_v60 = vld [vmem:[%s5773_s8] sm:$0xf] }
 0x218   : > { %1866 = vmatpush.bf16.msra.mxu0 %v3619_v17  ;;  %1879 = vmatpush.bf16.msra.mxu1 %v3747_v18  ;;  %v4940_v17 = vld [vmem:[#allocation7 + $0x18c] sm:$0xf0]  ;;  %v4134_v18 = vld [vmem:[#allocation7 + $0x60] sm:$0xf] }
 0x219   : > { %v4279_v19 = vor.u32 %v4940_v17, %v4278_v16  ;;  %v4894_v17 = vld [vmem:[#allocation7 + $0x24] sm:$0xf] }
 0x21a   : > { %1891 = vmatpush.bf16.msra.mxu2 %v3891_v24  ;;  %1904 = vmatpush.bf16.msra.mxu3 %v4019_v25  ;;  %v4135_v24 = vor.u32 %v4904_v20, %v4134_v18  ;;  %v4118_v25 = vld [vmem:[#allocation7 + $0x40] sm:$0xf]  ;;  %v4296_v18 = vld [vmem:[#allocation7 + $0x1b0] sm:$0xf0] }
 0x21c   : > { %1867 = vmatpush.bf16.msra.mxu0 %v3603_v29  ;;  %1880 = vmatpush.bf16.msra.mxu1 %v3731_v22  ;;  %v4102_v29 = vld [vmem:[#allocation7 + $0x20] sm:$0xf]  ;;  %v4896_v22 = vld [vmem:[#allocation7 + $0x2c] sm:$0xf0] }
 0x21d   : > { %v4103_v34 = vor.u32 %v4896_v22, %v4102_v29  ;;  %v4956_v29 = vld [vmem:[#allocation7 + $0x20c] sm:$0xf0]  ;;  %v4582_v22 = vld [vmem:[#allocation7 + $0x3e0] sm:$0xf] }
 0x21e   : > { %1892 = vmatpush.bf16.msra.mxu2 %v3875_v38  ;;  %1905 = vmatpush.bf16.msra.mxu3 %v4003_v39  ;;  %v4203_v38 = vor.u32 %v4918_v32, %v4200_v33  ;;  %v4914_v39 = vld [vmem:[#allocation7 + $0xc4] sm:$0xf]  ;;  %v4264_v32 = vld [vmem:[#allocation7 + $0x170] sm:$0xf0]  ;;  %v4583_v33 = vor.u32 %v5016_v30, %v4582_v22  ;;  %v4206_v30 = vld [vmem:[#allocation7 + $0xe8] sm:$0xf] }
 0x21f   : > { %v4187_v41 = vor.u32 %v4914_v39, %v4184_v40  ;;  %v4456_v39 = vld [vmem:[#allocation7 + $0x2f0] sm:$0xf0] }
 0x220   : > { %1868 = vmatpush.bf16.msra.mxu0 %v3587_v46  ;;  %1881 = vmatpush.bf16.msra.mxu1 %v3715_v47  ;;  %v4928_v46 = vld [vmem:[#allocation7 + $0x12c] sm:$0xf0]  ;;  %v4422_v47 = vld [vmem:[#allocation7 + $0x2a0] sm:$0xf]  ;;  %v4360_v22 = vld [vmem:[#allocation7 + $0x230] sm:$0xf0] }
 0x221   : > { %v4231_v48 = vor.u32 %v4928_v46, %v4230_v45  ;;  %v4248_v45 = vld [vmem:[#allocation7 + $0x150] sm:$0xf0]  ;;  %v4978_v46 = vld [vmem:[#allocation7 + $0x2c4] sm:$0xf] }
 0x222   : > { %1893 = vmatpush.bf16.msra.mxu2 %v3859_v52  ;;  %1906 = vmatpush.bf16.msra.mxu3 %v3987_v53  ;;  %v4214_v53 = vld [vmem:[#allocation7 + $0x100] sm:$0xf] }
 0x223   : > { %1869 = vmatmul.bf16.vlgmr.msra.gmra.mxu0 %v5625_v36  ;;  %1882 = vmatmul.bf16.vlgmr.msra.gmra.mxu1 %v5627_v37  ;;  %v4439_v36 = vor.u32 %v4980_v11, %v4438_v9  ;;  %v4151_v37 = vor.u32 %v4908_v15, %v4150_v13  ;;  %v4215_v57 = vor.u32 %v4924_v54, %v4214_v53  ;;  %v4946_v9 = vld [vmem:[#allocation7 + $0x1c4] sm:$0xf]  ;;  %v4312_v11 = vld [vmem:[#allocation7 + $0x1d0] sm:$0xf0]  ;;  %v4964_v15 = vld [vmem:[#allocation7 + $0x24c] sm:$0xf0] }
 0x224   : > { %2699 = vmatpush.bf16.msrb.mxu0 %v4199_v49  ;;  %2712 = vmatpush.bf16.msrb.mxu1 %v4327_v51  ;;  %v4976_v49 = vld [vmem:[#allocation7 + $0x2ac] sm:$0xf0]  ;;  %v4152_v51 = vld [vmem:[#allocation7 + $0x90] sm:$0xf0]  ;;  %v4315_v13 = vor.u32 %v4946_v9, %v4312_v11  ;;  %v4926_v53 = vld [vmem:[#allocation7 + $0x124] sm:$0xf] }
 0x225   : > { %v4423_v52 = vor.u32 %v4976_v49, %v4422_v47  ;;  %v4155_v56 = vor.u32 %v4906_v50, %v4152_v51  ;;  %v4550_v50 = vld [vmem:[#allocation7 + $0x3a0] sm:$0xf]  ;;  %v5008_v51 = vld [vmem:[#allocation7 + $0x3ac] sm:$0xf0]  ;;  %v4232_v54 = vld [vmem:[#allocation7 + $0x130] sm:$0xf0] }
 0x226   : > { %1894 = vmatpush.bf16.msra.mxu2 %v3843_v2  ;;  %1907 = vmatpush.bf16.msra.mxu3 %v3971_v3  ;;  %v4390_v2 = vld [vmem:[#allocation7 + $0x260] sm:$0xf]  ;;  %v4968_v3 = vld [vmem:[#allocation7 + $0x26c] sm:$0xf0]  ;;  %v4235_v58 = vor.u32 %v4926_v53, %v4232_v54 }
 0x227   : > { %v4391_v6 = vor.u32 %v4968_v3, %v4390_v2  ;;  %v4922_v3 = vld [vmem:[#allocation7 + $0x104] sm:$0xf]  ;;  %v4518_v11 = vld [vmem:[#allocation7 + $0x360] sm:$0xf] }
 0x228   : > { %2700 = vmatpush.bf16.msrb.mxu0 %v4183_v62  ;;  %2713 = vmatpush.bf16.msrb.mxu1 %v4311_v1  ;;  %v4950_v62 = vld [vmem:[#allocation7 + $0x1e4] sm:$0xf]  ;;  %v4328_v1 = vld [vmem:[#allocation7 + $0x1f0] sm:$0xf0] }
 0x229   : > { %1895 = vmatmul.bf16.vlgmr.msra.gmra.mxu2 %v5631_v63  ;;  %1908 = vmatmul.bf16.vlgmr.msra.gmra.mxu3 %v5633_v0  ;;  %v4119_v63 = vor.u32 %v4900_v26, %v4118_v25  ;;  %v4247_v0 = vor.u32 %v4932_v28, %v4246_v27  ;;  %v4331_v5 = vor.u32 %v4950_v62, %v4328_v1  ;;  %v4890_v25 = vld [vmem:[#allocation7 + $0x4] sm:$0xf]  ;;  %v4280_v27 = vld [vmem:[#allocation7 + $0x190] sm:$0xf0]  ;;  %v4534_v62 = vld [vmem:[#allocation7 + $0x380] sm:$0xf] }
 0x22a   : > { %2725 = vmatpush.bf16.msrb.mxu2 %v4455_v8  ;;  %v4120_v8 = vld [vmem:[#allocation7 + $0x50] sm:$0xf0]  ;;  %v4938_v26 = vld [vmem:[#allocation7 + $0x184] sm:$0xf]  ;;  %2738 = vmatpush.bf16.msrb.mxu3 %v4583_v33  ;;  %v5004_v1 = vld [vmem:[#allocation7 + $0x38c] sm:$0xf0] }
 0x22b   : > { %v4535_v2 = vor.u32 %v5004_v1, %v4534_v62 }
 0x22c   : > { %2701 = vmatpush.bf16.msrb.mxu0 %v4167_v12  ;;  %2714 = vmatpush.bf16.msrb.mxu1 %v4295_v14  ;;  %v4123_v12 = vor.u32 %v4898_v7, %v4120_v8  ;;  %v4374_v14 = vld [vmem:[#allocation7 + $0x240] sm:$0xf]  ;;  %v4408_v8 = vld [vmem:[#allocation7 + $0x290] sm:$0xf0] }
 0x22d   : > { %v4375_v16 = vor.u32 %v4964_v15, %v4374_v14  ;;  %v4966_v14 = vld [vmem:[#allocation7 + $0x264] sm:$0xf]  ;;  %v4392_v15 = vld [vmem:[#allocation7 + $0x270] sm:$0xf0] }
 0x22e   : > { %2726 = vmatpush.bf16.msrb.mxu2 %v4439_v36  ;;  %v4104_v36 = vld [vmem:[#allocation7 + $0x30] sm:$0xf0] }
 0x230   : > { %2702 = vmatpush.bf16.msrb.mxu0 %v4151_v37  ;;  %2715 = vmatpush.bf16.msrb.mxu1 %v4279_v19  ;;  %v4942_v37 = vld [vmem:[#allocation7 + $0x1a4] sm:$0xf]  ;;  %v4107_v19 = vor.u32 %v4894_v17, %v4104_v36 }
 0x231   : > { %v4299_v20 = vor.u32 %v4942_v37, %v4296_v18  ;;  %v4395_v37 = vor.u32 %v4966_v14, %v4392_v15  ;;  %v4502_v18 = vld [vmem:[#allocation7 + $0x340] sm:$0xf]  ;;  %v4142_v15 = vld [vmem:[#allocation7 + $0x68] sm:$0xf] }
 0x232   : > { %2727 = vmatpush.bf16.msrb.mxu2 %v4423_v52  ;;  %v4551_v52 = vor.u32 %v5008_v51, %v4550_v50  ;;  %v4584_v51 = vld [vmem:[#allocation7 + $0x3f0] sm:$0xf0] }
 0x234   : > { %2703 = vmatpush.bf16.msrb.mxu0 %v4135_v24  ;;  %2716 = vmatpush.bf16.msrb.mxu1 %v4263_v10  ;;  %v4359_v24 = vor.u32 %v4960_v23, %v4358_v21  ;;  %v4088_v10 = vld [vmem:[#allocation7 + $0x10] sm:$0xf0]  ;;  %v4962_v21 = vld [vmem:[#allocation7 + $0x244] sm:$0xf] }
 0x235   : > { %v4091_v28 = vor.u32 %v4890_v25, %v4088_v10  ;;  %v4376_v23 = vld [vmem:[#allocation7 + $0x250] sm:$0xf0] }
 0x236   : > { %2728 = vmatpush.bf16.msrb.mxu2 %v4407_v59  ;;  %v4424_v59 = vld [vmem:[#allocation7 + $0x2b0] sm:$0xf0]  ;;  %v4379_v25 = vor.u32 %v4962_v21, %v4376_v23 }
 0x237   : > { %v4427_v61 = vor.u32 %v4974_v55, %v4424_v59  ;;  %v5010_v59 = vld [vmem:[#allocation7 + $0x3c4] sm:$0xf] }
 0x238   : > { %2704 = vmatpush.bf16.msrb.mxu0 %v4119_v63  ;;  %2717 = vmatpush.bf16.msrb.mxu1 %v4247_v0  ;;  %v4283_v63 = vor.u32 %v4938_v26, %v4280_v27  ;;  %v4342_v0 = vld [vmem:[#allocation7 + $0x200] sm:$0xf] }
 0x23a   : > { %2729 = vmatpush.bf16.msrb.mxu2 %v4391_v6  ;;  %v1057_v6 = vperm.slane %v5652_v60, 0 }
 0x23c   : > { %2705 = vmatpush.bf16.msrb.mxu0 %v4103_v34  ;;  %2718 = vmatpush.bf16.msrb.mxu1 %v4231_v48  ;;  %v4343_v34 = vor.u32 %v4956_v29, %v4342_v0  ;;  %v4440_v48 = vld [vmem:[#allocation7 + $0x2d0] sm:$0xf0]  ;;  %v4958_v29 = vld [vmem:[#allocation7 + $0x224] sm:$0xf] }
 0x23d   : > { %v4443_v49 = vor.u32 %v4978_v46, %v4440_v48  ;;  %v5014_v46 = vld [vmem:[#allocation7 + $0x3e4] sm:$0xf]  ;;  %v4190_v48 = vld [vmem:[#allocation7 + $0xc8] sm:$0xf] }
 0x23e   : > { %2730 = vmatpush.bf16.msrb.mxu2 %v4375_v16  ;;  %v4587_v54 = vor.u32 %v5014_v46, %v4584_v51  ;;  %v4094_v51 = vld [vmem:[#allocation7 + $0x8] sm:$0xf] }
 0x240   : > { %2706 = vmatpush.bf16.msrb.mxu0 %v4087_v35  ;;  %2719 = vmatpush.bf16.msrb.mxu1 %v4215_v57  ;;  %v4267_v35 = vor.u32 %v4934_v31, %v4264_v32  ;;  %v4921_v31 = vld [vmem:[#allocation7 + $0xf4] sm:$0xf0]  ;;  %v4363_v32 = vor.u32 %v4958_v29, %v4360_v22  ;;  %v4998_v29 = vld [vmem:[#allocation7 + $0x364] sm:$0xf]  ;;  %v4520_v22 = vld [vmem:[#allocation7 + $0x370] sm:$0xf0] }
 0x242   : > { %2731 = vmatpush.bf16.msrb.mxu2 %v4359_v24 }
 0x244   : > { %2751 = vmatpush.bf16.msra.mxu0 %v4203_v38  ;;  %2764 = vmatpush.bf16.msra.mxu1 %v4331_v5  ;;  %v4982_v38 = vld [vmem:[#allocation7 + $0x2e4] sm:$0xf] }
 0x245   : > { %v4459_v40 = vor.u32 %v4982_v38, %v4456_v39  ;;  %v4970_v5 = vld [vmem:[#allocation7 + $0x284] sm:$0xf]  ;;  %v1058_v39 = vperm.slane %v5652_v60, 1 }
 0x246   : > { %2732 = vmatpush.bf16.msrb.mxu2 %v4343_v34  ;;  %v4411_v9 = vor.u32 %v4970_v5, %v4408_v8  ;;  %v4552_v8 = vld [vmem:[#allocation7 + $0x3b0] sm:$0xf0] }
 0x248   : > { %2752 = vmatpush.bf16.msra.mxu0 %v4187_v41  ;;  %2765 = vmatpush.bf16.msra.mxu1 %v4315_v13  ;;  %v4566_v41 = vld [vmem:[#allocation7 + $0x3c0] sm:$0xf] }
 0x249   : > { %v4567_v43 = vor.u32 %v5012_v42, %v4566_v41  ;;  %v4988_v41 = vld [vmem:[#allocation7 + $0x30c] sm:$0xf0]  ;;  %v4207_v42 = vor.u32 %v4921_v31, %v4206_v30 }
 0x24a   : > { %2777 = vmatpush.bf16.msra.mxu2 %v4459_v40  ;;  %v4470_v40 = vld [vmem:[#allocation7 + $0x300] sm:$0xf] }
 0x24b   : > { %2739 = vmatpush.bf16.msrb.mxu3 %v4567_v43  ;;  %v4471_v43 = vor.u32 %v4988_v41, %v4470_v40  ;;  %v4302_v40 = vld [vmem:[#allocation7 + $0x1a8] sm:$0xf]  ;;  %v4945_v41 = vld [vmem:[#allocation7 + $0x1b4] sm:$0xf0] }
 0x24c   : > { %2753 = vmatpush.bf16.msra.mxu0 %v4171_v44  ;;  %2766 = vmatpush.bf16.msra.mxu1 %v4299_v20  ;;  %v4930_v44 = vld [vmem:[#allocation7 + $0x144] sm:$0xf] }
 0x24d   : > { %v4251_v47 = vor.u32 %v4930_v44, %v4248_v45  ;;  %v4954_v44 = vld [vmem:[#allocation7 + $0x204] sm:$0xf]  ;;  %v4344_v45 = vld [vmem:[#allocation7 + $0x210] sm:$0xf0] }
 0x24e   : > { %2778 = vmatpush.bf16.msra.mxu2 %v4443_v49  ;;  %v4917_v49 = vld [vmem:[#allocation7 + $0xd4] sm:$0xf0]  ;;  %v4347_v50 = vor.u32 %v4954_v44, %v4344_v45 }
 0x24f   : > { %2740 = vmatpush.bf16.msrb.mxu3 %v4551_v52  ;;  %v4191_v55 = vor.u32 %v4917_v49, %v4190_v48 }
 0x250   : > { %2754 = vmatpush.bf16.msra.mxu0 %v4155_v56  ;;  %2767 = vmatpush.bf16.msra.mxu1 %v4283_v63  ;;  %v4992_v63 = vld [vmem:[#allocation7 + $0x32c] sm:$0xf0] }
 0x252   : > { %2779 = vmatpush.bf16.msra.mxu2 %v4427_v61  ;;  %v4568_v61 = vld [vmem:[#allocation7 + $0x3d0] sm:$0xf0] }
 0x253   : > { %2741 = vmatpush.bf16.msrb.mxu3 %v4535_v2  ;;  %v4571_v2 = vor.u32 %v5010_v59, %v4568_v61  ;;  %v4208_v59 = vld [vmem:[#allocation7 + $0xf8] sm:$0xf0] }
 0x254   : > { %2755 = vmatpush.bf16.msra.mxu0 %v4139_v4  ;;  %2768 = vmatpush.bf16.msra.mxu1 %v4267_v35  ;;  %v4216_v4 = vld [vmem:[#allocation7 + $0x110] sm:$0xf0] }
 0x255   : > { %v4219_v7 = vor.u32 %v4922_v3, %v4216_v4  ;;  %v4158_v4 = vld [vmem:[#allocation7 + $0x88] sm:$0xf] }
 0x256   : > { %2780 = vmatpush.bf16.msra.mxu2 %v4411_v9 }
 0x258   : > { %2756 = vmatpush.bf16.msra.mxu0 %v4123_v12  ;;  %2769 = vmatpush.bf16.msra.mxu1 %v4251_v47  ;;  %v5000_v12 = vld [vmem:[#allocation7 + $0x36c] sm:$0xf0] }
 0x259   : > { %v4519_v13 = vor.u32 %v5000_v12, %v4518_v11 }
 0x25a   : > { %2781 = vmatpush.bf16.msra.mxu2 %v4395_v37  ;;  %v4953_v37 = vld [vmem:[#allocation7 + $0x1f4] sm:$0xf0] }
 0x25b   : > { %2742 = vmatpush.bf16.msrb.mxu3 %v4519_v13 }
 0x25c   : > { %2757 = vmatpush.bf16.msra.mxu0 %v4107_v19  ;;  %2770 = vmatpush.bf16.msra.mxu1 %v4235_v58  ;;  %v4996_v19 = vld [vmem:[#allocation7 + $0x34c] sm:$0xf0]  ;;  %v4913_v58 = vld [vmem:[#allocation7 + $0xb4] sm:$0xf0] }
 0x25d   : > { %v4503_v20 = vor.u32 %v4996_v19, %v4502_v18  ;;  %v5002_v18 = vld [vmem:[#allocation7 + $0x384] sm:$0xf]  ;;  %v4536_v19 = vld [vmem:[#allocation7 + $0x390] sm:$0xf0] }
 0x25e   : > { %2782 = vmatpush.bf16.msra.mxu2 %v4379_v25  ;;  %v4539_v23 = vor.u32 %v5002_v18, %v4536_v19  ;;  %v4254_v19 = vld [vmem:[#allocation7 + $0x148] sm:$0xf] }
 0x25f   : > { %v1714_v56 = vpop.f32.mrf.mxu0  ;;  %v1727_v57 = vpop.f32.mrf.mxu1  ;;  %2743 = vmatpush.bf16.msrb.mxu3 %v4503_v20 }
 0x260   : > { %2758 = vmatpush.bf16.msra.mxu0 %v4091_v28  ;;  %2771 = vmatpush.bf16.msra.mxu1 %v4219_v7  ;;  %v1715_v16 = vadd.f32 %v1714_v56, %v1057_v6  ;;  %v4486_v28 = vld [vmem:[#allocation7 + $0x320] sm:$0xf]  ;;  %v4174_v56 = vld [vmem:[#allocation7 + $0xa8] sm:$0xf]  ;;  %v4909_v6 = vld [vmem:[#allocation7 + $0x94] sm:$0xf0] }
 0x261   : > { %v4487_v0 = vor.u32 %v4992_v63, %v4486_v28  ;;  %v4175_v3 = vor.u32 %v4913_v58, %v4174_v56  ;;  %v5006_v7 = vld [vmem:[#allocation7 + $0x3a4] sm:$0xf]  ;;  %v4159_v14 = vor.u32 %v4909_v6, %v4158_v4  ;;  %v4318_v28 = vld [vmem:[#allocation7 + $0x1c8] sm:$0xf]  ;;  %v4488_v56 = vld [vmem:[#allocation7 + $0x330] sm:$0xf0] }
 0x262   : > { %v1728_v24 = vadd.f32 %v1727_v57, %v1715_v16  ;;  %2783 = vmatpush.bf16.msra.mxu2 %v4363_v32  ;;  %v4555_v12 = vor.u32 %v5006_v7, %v4552_v8  ;;  %v4905_v16 = vld [vmem:[#allocation7 + $0x74] sm:$0xf0]  ;;  %v4523_v32 = vor.u32 %v4998_v29, %v4520_v22  ;;  %v4919_v58 = vld [vmem:[#allocation7 + $0xec] sm:$0xf]  ;;  %v4462_v8 = vld [vmem:[#allocation7 + $0x2e8] sm:$0xf] }
 0x263   : > { %2744 = vmatpush.bf16.msrb.mxu3 %v4487_v0  ;;  %v4143_v25 = vor.u32 %v4905_v16, %v4142_v15  ;;  %v4949_v0 = vld [vmem:[#allocation7 + $0x1d4] sm:$0xf0]  ;;  %v4211_v7 = vor.u32 %v4919_v58, %v4208_v59  ;;  %v4192_v15 = vld [vmem:[#allocation7 + $0xd8] sm:$0xf0]  ;;  %v4238_v22 = vld [vmem:[#allocation7 + $0x128] sm:$0xf] }
 0x264   : > { %v4937_v6 = vld [vmem:[#allocation7 + $0x174] sm:$0xf0]  ;;  %v4899_v58 = vld [vmem:[#allocation7 + $0x4c] sm:$0xf]  ;;  %v4128_v59 = vld [vmem:[#allocation7 + $0x58] sm:$0xf0] }
 0x266   : > { %2784 = vmatpush.bf16.msra.mxu2 %v4347_v50  ;;  %v4303_v50 = vor.u32 %v4945_v41, %v4302_v40  ;;  %v4222_v40 = vld [vmem:[#allocation7 + $0x108] sm:$0xf]  ;;  %v4925_v41 = vld [vmem:[#allocation7 + $0x114] sm:$0xf0] }
 0x267   : > { %v1716_v17 = vpop.f32.mrf.mxu0  ;;  %v1729_v36 = vpop.f32.mrf.mxu1  ;;  %2745 = vmatpush.bf16.msrb.mxu3 %v4471_v43  ;;  %v4504_v43 = vld [vmem:[#allocation7 + $0x350] sm:$0xf0] }
 0x268   : > { %v4334_v17 = vld [vmem:[#allocation7 + $0x1e8] sm:$0xf] }
 0x26b   : > { %2790 = vmatpush.bf16.msra.mxu3 %v4587_v54  ;;  %v4941_v54 = vld [vmem:[#allocation7 + $0x194] sm:$0xf0] }
 0x26c   : > { %v1740_v10 = vpop.f32.mrf.mxu2  ;;  %v1753_v26 = vpop.f32.mrf.mxu3 }
 0x26d   : > { %v1741_v27 = vadd.f32 %v1740_v10, %v1728_v24  ;;  %v4335_v10 = vor.u32 %v4953_v37, %v4334_v17 }
 0x26f   : > { %v1754_v34 = vadd.f32 %v1753_v26, %v1741_v27  ;;  %2791 = vmatpush.bf16.msra.mxu3 %v4571_v2  ;;  %v4126_v26 = vld [vmem:[#allocation7 + $0x48] sm:$0xf]  ;;  %v4901_v27 = vld [vmem:[#allocation7 + $0x54] sm:$0xf0] }
 0x270   : > { %v1766_v33 = vpop.f32.mrf.mxu0  ;;  %v1779_v35 = vpop.f32.mrf.mxu1 }
 0x271   : > { %v1913_v38 = vmax.f32 %v1754_v34, 0.0  ;;  %v1767_v57 = vadd.f32 %v1766_v33, %v1058_v39  ;;  %v1059_v34 = vperm.slane %v5652_v60, 2  ;;  %v4127_v33 = vor.u32 %v4901_v27, %v4126_v26  ;;  %v4897_v39 = vld [vmem:[#allocation7 + $0x34] sm:$0xf0] }
 0x273   : > { %v5656_v47 = vpack.c.bf16 %v1913_v38, %v1913_v38  ;;  %v1780_v5 = vadd.f32 %v1779_v35, %v1767_v57  ;;  %2792 = vmatpush.bf16.msra.mxu3 %v4555_v12  ;;  %v4319_v35 = vor.u32 %v4949_v0, %v4318_v28  ;;  %v4110_v38 = vld [vmem:[#allocation7 + $0x28] sm:$0xf] }
 0x274   : > { %v1742_v52 = vpop.f32.mrf.mxu2  ;;  %v1755_v53 = vpop.f32.mrf.mxu3  ;;  %v4111_v49 = vor.u32 %v4897_v39, %v4110_v38 }
 0x275   : > { %2707 = vmatmul.bf16.vlgmr.msrb.gmra.mxu0 %v5656_v47  ;;  %v4893_v52 = vld [vmem:[#allocation7 + $0x14] sm:$0xf0]  ;;  %v4286_v53 = vld [vmem:[#allocation7 + $0x188] sm:$0xf] }
 0x276   : > { %2803 = vmatpush.bf16.msrb.mxu0 %v4207_v42  ;;  %v4994_v42 = vld [vmem:[#allocation7 + $0x344] sm:$0xf]  ;;  %v4287_v4 = vor.u32 %v4941_v54, %v4286_v53 }
 0x277   : > { %2793 = vmatpush.bf16.msra.mxu3 %v4539_v23  ;;  %v4507_v48 = vor.u32 %v4994_v42, %v4504_v43  ;;  %v4414_v42 = vld [vmem:[#allocation7 + $0x288] sm:$0xf]  ;;  %v4973_v43 = vld [vmem:[#allocation7 + $0x294] sm:$0xf0] }
 0x278   : > { %v1768_v62 = vpop.f32.mrf.mxu0  ;;  %v1781_v1 = vpop.f32.mrf.mxu1  ;;  %v4415_v53 = vor.u32 %v4973_v43, %v4414_v42  ;;  %v4574_v43 = vld [vmem:[#allocation7 + $0x3c8] sm:$0xf] }
 0x27a   : > { %2804 = vmatpush.bf16.msrb.mxu0 %v4191_v55  ;;  %v4990_v55 = vld [vmem:[#allocation7 + $0x324] sm:$0xf] }
 0x27b   : > { %2794 = vmatpush.bf16.msra.mxu3 %v4523_v32  ;;  %v4491_v61 = vor.u32 %v4990_v55, %v4488_v56  ;;  %v4907_v32 = vld [vmem:[#allocation7 + $0x8c] sm:$0xf]  ;;  %v4398_v55 = vld [vmem:[#allocation7 + $0x268] sm:$0xf] }
 0x27c   : > { %v1792_v9 = vpop.f32.mrf.mxu2  ;;  %v1805_v11 = vpop.f32.mrf.mxu3 }
 0x27d   : > { %v1793_v13 = vadd.f32 %v1792_v9, %v1780_v5  ;;  %v4270_v5 = vld [vmem:[#allocation7 + $0x168] sm:$0xf]  ;;  %v4986_v9 = vld [vmem:[#allocation7 + $0x304] sm:$0xf] }
 0x27e   : > { %2805 = vmatpush.bf16.msrb.mxu0 %v4175_v3  ;;  %v4095_v3 = vor.u32 %v4893_v52, %v4094_v51  ;;  %v4223_v51 = vor.u32 %v4925_v41, %v4222_v40  ;;  %v1060_v52 = vperm.slane %v5652_v60, 3 }
 0x27f   : > { %v1806_v36 = vadd.f32 %v1805_v11, %v1793_v13  ;;  %2795 = vmatpush.bf16.msra.mxu3 %v4507_v48  ;;  %v4472_v11 = vld [vmem:[#allocation7 + $0x310] sm:$0xf0]  ;;  %v4985_v13 = vld [vmem:[#allocation7 + $0x2f4] sm:$0xf0] }
 0x280   : > { %v1818_v20 = vpop.f32.mrf.mxu0  ;;  %v1831_v21 = vpop.f32.mrf.mxu1  ;;  %v4475_v16 = vor.u32 %v4986_v9, %v4472_v11  ;;  %v4463_v37 = vor.u32 %v4985_v13, %v4462_v8  ;;  %v4943_v11 = vld [vmem:[#allocation7 + $0x1ac] sm:$0xf] }
 0x281   : > { %v1914_v24 = vmax.f32 %v1806_v36, 0.0  ;;  %v1819_v44 = vadd.f32 %v1818_v20, %v1059_v34  ;;  %v4271_v36 = vor.u32 %v4937_v6, %v4270_v5  ;;  %v4933_v20 = vld [vmem:[#allocation7 + $0x154] sm:$0xf0]  ;;  %v4895_v6 = vld [vmem:[#allocation7 + $0x2c] sm:$0xf] }
 0x282   : > { %2806 = vmatpush.bf16.msrb.mxu0 %v4159_v14  ;;  %v4915_v14 = vld [vmem:[#allocation7 + $0xcc] sm:$0xf]  ;;  %v4255_v28 = vor.u32 %v4933_v20, %v4254_v19  ;;  %v4929_v34 = vld [vmem:[#allocation7 + $0x134] sm:$0xf0] }
 0x283   : > { %v5659_v63 = vpack.c.bf16 %v1914_v24, %v1914_v24  ;;  %v1832_v57 = vadd.f32 %v1831_v21, %v1819_v44  ;;  %2796 = vmatpush.bf16.msra.mxu3 %v4491_v61  ;;  %v4195_v18 = vor.u32 %v4915_v14, %v4192_v15  ;;  %v4446_v21 = vld [vmem:[#allocation7 + $0x2c8] sm:$0xf]  ;;  %v4981_v24 = vld [vmem:[#allocation7 + $0x2d4] sm:$0xf0]  ;;  %v4903_v44 = vld [vmem:[#allocation7 + $0x6c] sm:$0xf] }
 0x284   : > { %v1794_v30 = vpop.f32.mrf.mxu2  ;;  %v1807_v31 = vpop.f32.mrf.mxu3  ;;  %v4447_v0 = vor.u32 %v4981_v24, %v4446_v21  ;;  %v4947_v61 = vld [vmem:[#allocation7 + $0x1cc] sm:$0xf]  ;;  %v4965_v5 = vld [vmem:[#allocation7 + $0x254] sm:$0xf0]  ;;  %v4366_v15 = vld [vmem:[#allocation7 + $0x228] sm:$0xf] }
 0x285   : > { %2720 = vmatmul.bf16.vlgmr.msrb.gmra.mxu1 %v5659_v63  ;;  %2759 = vmatmul.bf16.vlgmr.msra.gmra.mxu0 %v5656_v47  ;;  %v4430_v30 = vld [vmem:[#allocation7 + $0x2a8] sm:$0xf]  ;;  %v4977_v31 = vld [vmem:[#allocation7 + $0x2b4] sm:$0xf0]  ;;  %v4939_v21 = vld [vmem:[#allocation7 + $0x18c] sm:$0xf] }
 0x286   : > { %2807 = vmatpush.bf16.msrb.mxu0 %v4143_v25  ;;  %2816 = vmatpush.bf16.msrb.mxu1 %v4335_v10  ;;  %v4911_v25 = vld [vmem:[#allocation7 + $0xac] sm:$0xf]  ;;  %v4176_v10 = vld [vmem:[#allocation7 + $0xb8] sm:$0xf0]  ;;  %v4431_v38 = vor.u32 %v4977_v31, %v4430_v30 }
 0x287   : > { %2797 = vmatpush.bf16.msra.mxu3 %v4475_v16  ;;  %v4179_v29 = vor.u32 %v4911_v25, %v4176_v10  ;;  %v4288_v24 = vld [vmem:[#allocation7 + $0x198] sm:$0xf0]  ;;  %v4935_v30 = vld [vmem:[#allocation7 + $0x16c] sm:$0xf] }
 0x288   : > { %v1820_v45 = vpop.f32.mrf.mxu0  ;;  %v1833_v46 = vpop.f32.mrf.mxu1  ;;  %v4272_v31 = vld [vmem:[#allocation7 + $0x178] sm:$0xf0] }
 0x289   : > { %v4144_v45 = vld [vmem:[#allocation7 + $0x78] sm:$0xf0]  ;;  %v4275_v41 = vor.u32 %v4935_v30, %v4272_v31 }
 0x28a   : > { %2808 = vmatpush.bf16.msrb.mxu0 %v4127_v33  ;;  %2817 = vmatpush.bf16.msrb.mxu1 %v4319_v35  ;;  %v4160_v33 = vld [vmem:[#allocation7 + $0x98] sm:$0xf0]  ;;  %v4239_v35 = vor.u32 %v4929_v34, %v4238_v22  ;;  %v4147_v54 = vor.u32 %v4903_v44, %v4144_v45  ;;  %v4590_v22 = vld [vmem:[#allocation7 + $0x3e8] sm:$0xf]  ;;  %v5017_v34 = vld [vmem:[#allocation7 + $0x3f4] sm:$0xf0] }
 0x28b   : > { %v4163_v39 = vor.u32 %v4907_v32, %v4160_v33  ;;  %v4983_v32 = vld [vmem:[#allocation7 + $0x2ec] sm:$0xf]  ;;  %v4464_v33 = vld [vmem:[#allocation7 + $0x2f8] sm:$0xf0]  ;;  %v5013_v44 = vld [vmem:[#allocation7 + $0x3d4] sm:$0xf0] }
 0x28c   : > { %v1844_v62 = vpop.f32.mrf.mxu2  ;;  %v1857_v1 = vpop.f32.mrf.mxu3  ;;  %v4467_v42 = vor.u32 %v4983_v32, %v4464_v33  ;;  %v4931_v45 = vld [vmem:[#allocation7 + $0x14c] sm:$0xf]  ;;  %v4592_v30 = vld [vmem:[#allocation7 + $0x3f8] sm:$0xf0] }
 0x28d   : > { %v1845_v2 = vadd.f32 %v1844_v62, %v1832_v57  ;;  %v4969_v57 = vld [vmem:[#allocation7 + $0x274] sm:$0xf0]  ;;  %v4320_v62 = vld [vmem:[#allocation7 + $0x1d8] sm:$0xf0]  ;;  %v5011_v33 = vld [vmem:[#allocation7 + $0x3cc] sm:$0xf] }
 0x28e   : > { %2809 = vmatpush.bf16.msrb.mxu0 %v4111_v49  ;;  %2818 = vmatpush.bf16.msrb.mxu1 %v4303_v50  ;;  %v4951_v49 = vld [vmem:[#allocation7 + $0x1ec] sm:$0xf]  ;;  %v4336_v50 = vld [vmem:[#allocation7 + $0x1f8] sm:$0xf0]  ;;  %v4323_v60 = vor.u32 %v4947_v61, %v4320_v62 }
 0x28f   : > { %v1858_v12 = vadd.f32 %v1857_v1, %v1845_v2  ;;  %v4339_v56 = vor.u32 %v4951_v49, %v4336_v50  ;;  %v4399_v1 = vor.u32 %v4969_v57, %v4398_v55  ;;  %v4131_v2 = vor.u32 %v4899_v58, %v4128_v59  ;;  %v4256_v49 = vld [vmem:[#allocation7 + $0x158] sm:$0xf0]  ;;  %v4979_v50 = vld [vmem:[#allocation7 + $0x2cc] sm:$0xf]  ;;  %v4558_v55 = vld [vmem:[#allocation7 + $0x3a8] sm:$0xf] }
 0x290   : > { %v4927_v57 = vld [vmem:[#allocation7 + $0x12c] sm:$0xf]  ;;  %v4240_v58 = vld [vmem:[#allocation7 + $0x138] sm:$0xf0] }
 0x291   : > { %v1915_v17 = vmax.f32 %v1858_v12, 0.0  ;;  %v4304_v12 = vld [vmem:[#allocation7 + $0x1b8] sm:$0xf0]  ;;  %v4975_v59 = vld [vmem:[#allocation7 + $0x2ac] sm:$0xf] }
 0x292   : > { %2810 = vmatpush.bf16.msrb.mxu0 %v4095_v3  ;;  %2819 = vmatpush.bf16.msrb.mxu1 %v4287_v4  ;;  %v4382_v3 = vld [vmem:[#allocation7 + $0x248] sm:$0xf]  ;;  %v4432_v61 = vld [vmem:[#allocation7 + $0x2b8] sm:$0xf0] }
 0x293   : > { %v5664_v23 = vpack.c.bf16 %v1915_v17, %v1915_v17  ;;  %v4383_v13 = vor.u32 %v4965_v5, %v4382_v3  ;;  %v4307_v17 = vor.u32 %v4943_v11, %v4304_v12  ;;  %v5005_v3 = vld [vmem:[#allocation7 + $0x394] sm:$0xf0]  ;;  %v4971_v5 = vld [vmem:[#allocation7 + $0x28c] sm:$0xf]  ;;  %v4526_v11 = vld [vmem:[#allocation7 + $0x368] sm:$0xf] }
 0x294   : > { %v1846_v26 = vpop.f32.mrf.mxu2  ;;  %v1859_v27 = vpop.f32.mrf.mxu3  ;;  %v5001_v12 = vld [vmem:[#allocation7 + $0x374] sm:$0xf0] }
 0x295   : > { %2772 = vmatmul.bf16.vlgmr.msra.gmra.mxu1 %v5659_v63  ;;  %2811 = vmatmul.bf16.vlgmr.msrb.gmra.mxu0 %v5656_v47  ;;  %v4350_v27 = vld [vmem:[#allocation7 + $0x208] sm:$0xf] }
 0x296   : > { %2855 = vmatpush.bf16.msra.mxu0 %v4211_v7  ;;  %2733 = vmatmul.bf16.vlgmr.msrb.gmra.mxu2 %v5664_v23  ;;  %v4112_v7 = vld [vmem:[#allocation7 + $0x38] sm:$0xf0] }
 0x297   : > { %2820 = vmatpush.bf16.msrb.mxu1 %v4271_v36  ;;  %2829 = vmatpush.bf16.msrb.mxu2 %v4463_v37  ;;  %v4115_v14 = vor.u32 %v4895_v6, %v4112_v7  ;;  %v4961_v36 = vld [vmem:[#allocation7 + $0x234] sm:$0xf0]  ;;  %v4891_v37 = vld [vmem:[#allocation7 + $0xc] sm:$0xf]  ;;  %v4416_v6 = vld [vmem:[#allocation7 + $0x298] sm:$0xf0] }
 0x298   : > { %v4367_v10 = vor.u32 %v4961_v36, %v4366_v15  ;;  %v4527_v15 = vor.u32 %v5001_v12, %v4526_v11  ;;  %v4997_v36 = vld [vmem:[#allocation7 + $0x354] sm:$0xf0]  ;;  %v5019_v11 = vld [vmem:[#allocation8 + $0x8] sm:$0xff] }
 0x299   : > { %v5031_v12 = vld [vmem:[#allocation8 + $0x68] sm:$0xff] }
 0x29a   : > { %2856 = vmatpush.bf16.msra.mxu0 %v4195_v18  ;;  %v4096_v18 = vld [vmem:[#allocation7 + $0x18] sm:$0xf0] }
 0x29b   : > { %2821 = vmatpush.bf16.msrb.mxu1 %v4255_v28  ;;  %2830 = vmatpush.bf16.msrb.mxu2 %v4447_v0  ;;  %v4099_v26 = vor.u32 %v4891_v37, %v4096_v18  ;;  %v4957_v28 = vld [vmem:[#allocation7 + $0x214] sm:$0xf0]  ;;  %v4963_v37 = vld [vmem:[#allocation7 + $0x24c] sm:$0xf]  ;;  %v4384_v18 = vld [vmem:[#allocation7 + $0x258] sm:$0xf0] }
 0x29e   : > { %2857 = vmatpush.bf16.msra.mxu0 %v4179_v29  ;;  %v4291_v29 = vor.u32 %v4939_v21, %v4288_v24  ;;  %v4494_v21 = vld [vmem:[#allocation7 + $0x328] sm:$0xf]  ;;  %v4993_v24 = vld [vmem:[#allocation7 + $0x334] sm:$0xf0] }
 0x29f   : > { %2822 = vmatpush.bf16.msrb.mxu1 %v4239_v35  ;;  %2831 = vmatpush.bf16.msrb.mxu2 %v4431_v38  ;;  %v4351_v38 = vor.u32 %v4957_v28, %v4350_v27  ;;  %v4478_v28 = vld [vmem:[#allocation7 + $0x308] sm:$0xf] }
 0x2a0   : > { %v1870_v46 = vpop.f32.mrf.mxu0  ;;  %v1883_v48 = vpop.f32.mrf.mxu1 }
 0x2a1   : > { %v1871_v4 = vadd.f32 %v1870_v46, %v1060_v52  ;;  %v4575_v52 = vor.u32 %v5013_v44, %v4574_v43  ;;  %v5003_v43 = vld [vmem:[#allocation7 + $0x38c] sm:$0xf]  ;;  %v4544_v44 = vld [vmem:[#allocation7 + $0x398] sm:$0xf0] }
 0x2a2   : > { %2858 = vmatpush.bf16.msra.mxu0 %v4163_v39  ;;  %v4591_v39 = vor.u32 %v5017_v34, %v4590_v22  ;;  %v4352_v22 = vld [vmem:[#allocation7 + $0x218] sm:$0xf0]  ;;  %v5015_v34 = vld [vmem:[#allocation7 + $0x3ec] sm:$0xf] }
 0x2a3   : > { %2823 = vmatpush.bf16.msrb.mxu1 %v4223_v51  ;;  %2832 = vmatpush.bf16.msrb.mxu2 %v4415_v53  ;;  %v1884_v16 = vadd.f32 %v1883_v48, %v1871_v4  ;;  %v4448_v51 = vld [vmem:[#allocation7 + $0x2d8] sm:$0xf0]  ;;  %v4259_v53 = vor.u32 %v4931_v45, %v4256_v49  ;;  %v4923_v4 = vld [vmem:[#allocation7 + $0x10c] sm:$0xf]  ;;  %v4595_v32 = vor.u32 %v5015_v34, %v4592_v30  ;;  %v5036_v34 = vld [vmem:[#allocation8 + $0x90] sm:$0xff] }
 0x2a4   : > { %v4547_v45 = vor.u32 %v5003_v43, %v4544_v44  ;;  %v5034_v43 = vld [vmem:[#allocation8 + $0x80] sm:$0xff]  ;;  %v5049_v44 = vld [vmem:[#allocation8 + $0xf8] sm:$0xff] }
 0x2a6   : > { %2859 = vmatpush.bf16.msra.mxu0 %v4147_v54  ;;  %2824 = vmatmul.bf16.vlgmr.msrb.gmra.mxu1 %v5659_v63  ;;  %v4451_v54 = vor.u32 %v4979_v50, %v4448_v51  ;;  %v4995_v50 = vld [vmem:[#allocation7 + $0x34c] sm:$0xf]  ;;  %v4512_v51 = vld [vmem:[#allocation7 + $0x358] sm:$0xf0] }
 0x2a7   : > { %2868 = vmatpush.bf16.msra.mxu1 %v4339_v56  ;;  %2785 = vmatmul.bf16.vlgmr.msra.gmra.mxu2 %v5664_v23  ;;  %v5009_v56 = vld [vmem:[#allocation7 + $0x3b4] sm:$0xf0] }
 0x2a8   : > { %v1872_v8 = vpop.f32.mrf.mxu0  ;;  %v1885_v9 = vpop.f32.mrf.mxu1  ;;  %2833 = vmatpush.bf16.msrb.mxu2 %v4399_v1  ;;  %v4559_v62 = vor.u32 %v5009_v56, %v4558_v55  ;;  %v4435_v1 = vor.u32 %v4975_v59, %v4432_v61  ;;  %v4987_v56 = vld [vmem:[#allocation7 + $0x30c] sm:$0xf]  ;;  %v5025_v61 = vld [vmem:[#allocation8 + $0x38] sm:$0xff] }
 0x2a9   : > { %v4419_v9 = vor.u32 %v4971_v5, %v4416_v6  ;;  %v5021_v5 = vld [vmem:[#allocation8 + $0x18] sm:$0xff] }
 0x2aa   : > { %2860 = vmatpush.bf16.msra.mxu0 %v4131_v2  ;;  %v4542_v2 = vld [vmem:[#allocation7 + $0x388] sm:$0xf]  ;;  %v5033_v6 = vld [vmem:[#allocation8 + $0x78] sm:$0xff] }
 0x2ab   : > { %2869 = vmatpush.bf16.msra.mxu1 %v4323_v60  ;;  %v4224_v60 = vld [vmem:[#allocation7 + $0x118] sm:$0xf0]  ;;  %v4543_v7 = vor.u32 %v5005_v3, %v4542_v2  ;;  %v5023_v2 = vld [vmem:[#allocation8 + $0x28] sm:$0xff]  ;;  %v5022_v3 = vld [vmem:[#allocation8 + $0x20] sm:$0xff] }
 0x2ac   : > { %v1896_v19 = vpop.f32.mrf.mxu2  ;;  %v1909_v20 = vpop.f32.mrf.mxu3  ;;  %2834 = vmatpush.bf16.msrb.mxu2 %v4383_v13  ;;  %v4227_v8 = vor.u32 %v4923_v4, %v4224_v60  ;;  %v4967_v13 = vld [vmem:[#allocation7 + $0x26c] sm:$0xf] }
 0x2ad   : > { %v1897_v25 = vadd.f32 %v1896_v19, %v1884_v16 }
 0x2ae   : > { %2861 = vmatpush.bf16.msra.mxu0 %v4115_v14  ;;  %v4400_v14 = vld [vmem:[#allocation7 + $0x278] sm:$0xf0] }
 0x2af   : > { %v1910_v0 = vadd.f32 %v1909_v20, %v1897_v25  ;;  %2870 = vmatpush.bf16.msra.mxu1 %v4307_v17  ;;  %v4403_v16 = vor.u32 %v4967_v13, %v4400_v14  ;;  %v4510_v17 = vld [vmem:[#allocation7 + $0x348] sm:$0xf]  ;;  %v4387_v20 = vor.u32 %v4963_v37, %v4384_v18  ;;  %v4959_v25 = vld [vmem:[#allocation7 + $0x22c] sm:$0xf]  ;;  %v5018_v13 = vld [vmem:[#allocation8] sm:$0xff] }
 0x2b0   : > { %2835 = vmatpush.bf16.msrb.mxu2 %v4367_v10  ;;  %v4511_v19 = vor.u32 %v4997_v36, %v4510_v17  ;;  %v4368_v10 = vld [vmem:[#allocation7 + $0x238] sm:$0xf0]  ;;  %v5030_v14 = vld [vmem:[#allocation8 + $0x60] sm:$0xff]  ;;  %v5028_v18 = vld [vmem:[#allocation8 + $0x50] sm:$0xff] }
 0x2b1   : > { %v1916_v35 = vmax.f32 %v1910_v0, 0.0  ;;  %v4371_v27 = vor.u32 %v4959_v25, %v4368_v10  ;;  %v4989_v0 = vld [vmem:[#allocation7 + $0x314] sm:$0xf0]  ;;  %v5039_v25 = vld [vmem:[#allocation8 + $0xa8] sm:$0xff]  ;;  %v5026_v10 = vld [vmem:[#allocation8 + $0x40] sm:$0xff] }
 0x2b2   : > { %2862 = vmatpush.bf16.msra.mxu0 %v4099_v26  ;;  %v4495_v26 = vor.u32 %v4993_v24, %v4494_v21  ;;  %v4479_v31 = vor.u32 %v4989_v0, %v4478_v28  ;;  %v5029_v36 = vld [vmem:[#allocation8 + $0x58] sm:$0xff]  ;;  %v5027_v24 = vld [vmem:[#allocation8 + $0x48] sm:$0xff] }
 0x2b3   : > { %v5672_v40 = vpack.c.bf16 %v1916_v35, %v1916_v35  ;;  %2871 = vmatpush.bf16.msra.mxu1 %v4291_v29  ;;  %v4955_v29 = vld [vmem:[#allocation7 + $0x20c] sm:$0xf]  ;;  %v4576_v35 = vld [vmem:[#allocation7 + $0x3d8] sm:$0xf0] }
 0x2b4   : > { %v1898_v46 = vpop.f32.mrf.mxu2  ;;  %v1911_v48 = vpop.f32.mrf.mxu3  ;;  %2836 = vmatpush.bf16.msrb.mxu2 %v4351_v38  ;;  %v4579_v38 = vor.u32 %v5011_v33, %v4576_v35  ;;  %v5041_v37 = vld [vmem:[#allocation8 + $0xb8] sm:$0xff]  ;;  %v5035_v35 = vld [vmem:[#allocation8 + $0x88] sm:$0xff] }
 0x2b5   : > { %2746 = vmatmul.bf16.vlgmr.msrb.gmra.mxu3 %v5672_v40  ;;  %2863 = vmatmul.bf16.vlgmr.msra.gmra.mxu0 %v5656_v47  ;;  %v4243_v47 = vor.u32 %v4927_v57, %v4240_v58  ;;  %v4999_v46 = vld [vmem:[#allocation7 + $0x36c] sm:$0xf]  ;;  %v4528_v48 = vld [vmem:[#allocation7 + $0x378] sm:$0xf0] }
 0x2b6   : > { %2842 = vmatpush.bf16.msrb.mxu3 %v4591_v39  ;;  %v5007_v39 = vld [vmem:[#allocation7 + $0x3ac] sm:$0xf]  ;;  %v4531_v49 = vor.u32 %v4999_v46, %v4528_v48  ;;  %3175 = vmatpush.bf16.msrb.mxu0 %v5025_v61 }
 0x2b7   : > { %2872 = vmatpush.bf16.msra.mxu1 %v4275_v41  ;;  %2837 = vmatmul.bf16.vlgmr.msrb.gmra.mxu2 %v5664_v23  ;;  %v4560_v41 = vld [vmem:[#allocation7 + $0x3b8] sm:$0xf0] }
 0x2b8   : > { %2881 = vmatpush.bf16.msra.mxu2 %v4467_v42  ;;  %v4563_v42 = vor.u32 %v5007_v39, %v4560_v41 }
 0x2ba   : > { %2843 = vmatpush.bf16.msrb.mxu3 %v4575_v52  ;;  %v4515_v52 = vor.u32 %v4995_v50, %v4512_v51  ;;  %v5047_v51 = vld [vmem:[#allocation8 + $0xe8] sm:$0xff] }
 0x2bb   : > { %2873 = vmatpush.bf16.msra.mxu1 %v4259_v53  ;;  %v4991_v53 = vld [vmem:[#allocation7 + $0x32c] sm:$0xf] }
 0x2bc   : > { %2882 = vmatpush.bf16.msra.mxu2 %v4451_v54  ;;  %v4496_v54 = vld [vmem:[#allocation7 + $0x338] sm:$0xf0] }
 0x2bd   : > { %v4499_v55 = vor.u32 %v4991_v53, %v4496_v54 }
 0x2be   : > { %2844 = vmatpush.bf16.msrb.mxu3 %v4559_v62  ;;  %v5024_v62 = vld [vmem:[#allocation8 + $0x30] sm:$0xff] }
 0x2bf   : > { %2874 = vmatpush.bf16.msra.mxu1 %v4243_v47  ;;  %3176 = vmatpush.bf16.msrb.mxu0 %v5024_v62 }
 0x2c0   : > { %2883 = vmatpush.bf16.msra.mxu2 %v4435_v1 }
 0x2c2   : > { %2845 = vmatpush.bf16.msrb.mxu3 %v4543_v7  ;;  %v5032_v7 = vld [vmem:[#allocation8 + $0x70] sm:$0xff] }
 0x2c3   : > { %2875 = vmatpush.bf16.msra.mxu1 %v4227_v8  ;;  %3177 = vmatpush.bf16.msrb.mxu0 %v5023_v2  ;;  %v5044_v2 = vld [vmem:[#allocation8 + $0xd0] sm:$0xff] }
 0x2c4   : > { %2884 = vmatpush.bf16.msra.mxu2 %v4419_v9 }
 0x2c5   : > { %2798 = vmatmul.bf16.vlgmr.msra.gmra.mxu3 %v5672_v40 }
 0x2c6   : > { %2846 = vmatpush.bf16.msrb.mxu3 %v4527_v15  ;;  %2876 = vmatmul.bf16.vlgmr.msra.gmra.mxu1 %v5659_v63  ;;  %v4355_v63 = vor.u32 %v4955_v29, %v4352_v22  ;;  %v5037_v22 = vld [vmem:[#allocation8 + $0x98] sm:$0xff] }
 0x2c7   : > { %3178 = vmatpush.bf16.msrb.mxu0 %v5022_v3  ;;  %3188 = vmatpush.bf16.msrb.mxu1 %v5033_v6 }
 0x2c8   : > { %2885 = vmatpush.bf16.msra.mxu2 %v4403_v16 }
 0x2ca   : > { %2847 = vmatpush.bf16.msrb.mxu3 %v4511_v19  ;;  %v5040_v19 = vld [vmem:[#allocation8 + $0xb0] sm:$0xff] }
 0x2cb   : > { %3179 = vmatpush.bf16.msrb.mxu0 %v5021_v5  ;;  %3189 = vmatpush.bf16.msrb.mxu1 %v5032_v7 }
 0x2cc   : > { %2886 = vmatpush.bf16.msra.mxu2 %v4387_v20 }
 0x2ce   : > { %2848 = vmatpush.bf16.msrb.mxu3 %v4495_v26  ;;  %v5038_v26 = vld [vmem:[#allocation8 + $0xa0] sm:$0xff] }
 0x2cf   : > { %3190 = vmatpush.bf16.msrb.mxu1 %v5031_v12 }
 0x2d0   : > { %2887 = vmatpush.bf16.msra.mxu2 %v4371_v27  ;;  %v5693_v27 = vld [vmem:[%s5775_s10] sm:$0xf] }
 0x2d1   : > { %v2051_v29 = vperm.slane %v5693_v27, 0  ;;  %v2052_v48 = vperm.slane %v5693_v27, 1  ;;  %v2053_v3 = vperm.slane %v5693_v27, 2 }
 0x2d2   : > { %2849 = vmatpush.bf16.msrb.mxu3 %v4479_v31 }
 0x2d3   : > { %3191 = vmatpush.bf16.msrb.mxu1 %v5030_v14 }
 0x2d4   : > { %2888 = vmatpush.bf16.msra.mxu2 %v4355_v63 }
 0x2d5   : > { %2850 = vmatmul.bf16.vlgmr.msrb.gmra.mxu3 %v5672_v40 }
 0x2d6   : > { %2894 = vmatpush.bf16.msra.mxu3 %v4595_v32 }
 0x2d7   : > { %2889 = vmatmul.bf16.vlgmr.msra.gmra.mxu2 %v5664_v23  ;;  %v4480_v23 = vld [vmem:[#allocation7 + $0x318] sm:$0xf0]  ;;  %3192 = vmatpush.bf16.msrb.mxu1 %v5029_v36 }
 0x2d8   : > { %v4483_v57 = vor.u32 %v4987_v56, %v4480_v23  ;;  %3201 = vmatpush.bf16.msrb.mxu2 %v5041_v37  ;;  %v5046_v56 = vld [vmem:[#allocation8 + $0xe0] sm:$0xff] }
 0x2da   : > { %2895 = vmatpush.bf16.msra.mxu3 %v4579_v38 }
 0x2db   : > { %3193 = vmatpush.bf16.msrb.mxu1 %v5028_v18 }
 0x2dc   : > { %3202 = vmatpush.bf16.msrb.mxu2 %v5040_v19 }
 0x2de   : > { %2896 = vmatpush.bf16.msra.mxu3 %v4563_v42 }
 0x2df   : > { %3194 = vmatpush.bf16.msrb.mxu1 %v5027_v24 }
 0x2e0   : > { %3203 = vmatpush.bf16.msrb.mxu2 %v5039_v25 }
 0x2e2   : > { %2897 = vmatpush.bf16.msra.mxu3 %v4547_v45 }
 0x2e3   : > { %3195 = vmatpush.bf16.msrb.mxu1 %v5026_v10 }
 0x2e4   : > { %3204 = vmatpush.bf16.msrb.mxu2 %v5038_v26 }
 0x2e6   : > { %2898 = vmatpush.bf16.msra.mxu3 %v4531_v49  ;;  %v5048_v49 = vld [vmem:[#allocation8 + $0xf0] sm:$0xff] }
 0x2e8   : > { %3205 = vmatpush.bf16.msrb.mxu2 %v5037_v22 }
 0x2ea   : > { %2899 = vmatpush.bf16.msra.mxu3 %v4515_v52 }
 0x2ec   : > { %3206 = vmatpush.bf16.msrb.mxu2 %v5036_v34 }
 0x2ee   : > { %2900 = vmatpush.bf16.msra.mxu3 %v4499_v55 }
 0x2f0   : > { %3207 = vmatpush.bf16.msrb.mxu2 %v5035_v35 }
 0x2f2   : > { %2901 = vmatpush.bf16.msra.mxu3 %v4483_v57  ;;  %v2708_v58 = vpop.f32.mrf.mxu0 }
 0x2f3   : > { %v2709_v31 = vadd.f32 %v2708_v58, %v2051_v29 }
 0x2f4   : > { %3208 = vmatpush.bf16.msrb.mxu2 %v5034_v43 }
 0x2f5   : > { %2902 = vmatmul.bf16.vlgmr.msra.gmra.mxu3 %v5672_v40  ;;  %v5020_v40 = vld [vmem:[#allocation8 + $0x10] sm:$0xff] }
 0x2f6   : > { %3180 = vmatpush.bf16.msrb.mxu0 %v5020_v40  ;;  %3214 = vmatpush.bf16.msrb.mxu3 %v5049_v44  ;;  %v5042_v40 = vld [vmem:[#allocation8 + $0xc0] sm:$0xff] }
 0x2fa   : > { %v2710_v59 = vpop.f32.mrf.mxu0  ;;  %3181 = vmatpush.bf16.msrb.mxu0 %v5019_v11  ;;  %3215 = vmatpush.bf16.msrb.mxu3 %v5048_v49 }
 0x2fb   : > { %v5045_v59 = vld [vmem:[#allocation8 + $0xd8] sm:$0xff] }
 0x2fe   : > { %3182 = vmatpush.bf16.msrb.mxu0 %v5018_v13  ;;  %3216 = vmatpush.bf16.msrb.mxu3 %v5047_v51 }
 0x302   : > { %v2721_v47 = vpop.f32.mrf.mxu1  ;;  %v5682_v1 = vpop.f32.mrf.mxu0  ;;  %3217 = vmatpush.bf16.msrb.mxu3 %v5046_v56 }
 0x303   : > { %v2722_v32 = vadd.f32 %v2721_v47, %v2709_v31  ;;  %v2761_v52 = vadd.f32 %v5682_v1, %v2052_v48 }
 0x306   : > { %3218 = vmatpush.bf16.msrb.mxu3 %v5045_v59 }
 0x30a   : > { %v2723_v4 = vpop.f32.mrf.mxu1  ;;  %v2762_v60 = vpop.f32.mrf.mxu0  ;;  %3219 = vmatpush.bf16.msrb.mxu3 %v5044_v2 }
 0x30b   : > { %v5043_v60 = vld [vmem:[#allocation8 + $0xc8] sm:$0xff] }
 0x30e   : > { %3220 = vmatpush.bf16.msrb.mxu3 %v5043_v60 }
 0x312   : > { %v5684_v8 = vpop.f32.mrf.mxu1  ;;  %v5686_v9 = vpop.f32.mrf.mxu0  ;;  %3221 = vmatpush.bf16.msrb.mxu3 %v5042_v40 }
 0x313   : > { %v2774_v55 = vadd.f32 %v5684_v8, %v2761_v52  ;;  %v2813_v4 = vadd.f32 %v5686_v9, %v2053_v3 }
 0x319   : > { %v2734_v15 = vpop.f32.mrf.mxu2 }
 0x31a   : > { %v2775_v16 = vpop.f32.mrf.mxu1  ;;  %v2814_v17 = vpop.f32.mrf.mxu0  ;;  %v2735_v33 = vadd.f32 %v2734_v15, %v2722_v32 }
 0x31b   : > { %v2054_v16 = vperm.slane %v5693_v27, 3  ;;  %v5151_v27 = vld [vmem:[%s5777_s12] ss:$0 sm:$0xff] }
 0x321   : > { %v2736_v20 = vpop.f32.mrf.mxu2 }
 0x323   : > { %v5688_v21 = vpop.f32.mrf.mxu1 }
 0x324   : > { %v2826_v5 = vadd.f32 %v5688_v21, %v2813_v4 }
 0x32a   : > { %v2786_v28 = vpop.f32.mrf.mxu2 }
 0x32b   : > { %v2827_v0 = vpop.f32.mrf.mxu1  ;;  %v2787_v23 = vadd.f32 %v2786_v28, %v2774_v55 }
 0x332   : > { %v2864_v30 = vpop.f32.mrf.mxu0  ;;  %v2788_v63 = vpop.f32.mrf.mxu2 }
 0x333   : > { %v2865_v17 = vadd.f32 %v2864_v30, %v2054_v16 }
 0x338   : > { %v2747_v38 = vpop.f32.mrf.mxu3 }
 0x339   : > { %v2748_v39 = vadd.f32 %v2747_v38, %v2735_v33 }
 0x33a   : > { %v2866_v41 = vpop.f32.mrf.mxu0  ;;  %v2838_v45 = vpop.f32.mrf.mxu2 }
 0x33b   : > { %v2907_v42 = vmax.f32 %v2748_v39, 0.0  ;;  %v2839_v6 = vadd.f32 %v2838_v45, %v2826_v5 }
 0x33d   : > { %v2911_v46 = vpack.c.bf16 %v2907_v42, %v2907_v42 }
 0x33f   : > { %3183 = vmatmul.bf16.vlgmr.msrb.gmra.mxu0 %v2911_v46 }
 0x340   : > { %v2749_v50 = vpop.f32.mrf.mxu3 }
 0x342   : > { %v2840_v54 = vpop.f32.mrf.mxu2 }
 0x343   : > { %v2877_v53 = vpop.f32.mrf.mxu1 }
 0x344   : > { %v2878_v36 = vadd.f32 %v2877_v53, %v2865_v17 }
 0x348   : > { %v2799_v57 = vpop.f32.mrf.mxu3 }
 0x349   : > { %v2800_v58 = vadd.f32 %v2799_v57, %v2787_v23 }
 0x34b   : > { %v2908_v61 = vmax.f32 %v2800_v58, 0.0  ;;  %v2879_v62 = vpop.f32.mrf.mxu1 }
 0x34d   : > { %v2912_v47 = vpack.c.bf16 %v2908_v61, %v2908_v61 }
 0x34f   : > { %3196 = vmatmul.bf16.vlgmr.msrb.gmra.mxu1 %v2912_v47 }
 0x350   : > { %v2801_v1 = vpop.f32.mrf.mxu3 }
 0x358   : > { %v2851_v7 = vpop.f32.mrf.mxu3 }
 0x359   : > { %v2852_v8 = vadd.f32 %v2851_v7, %v2839_v6 }
 0x35a   : > { %v2890_v11 = vpop.f32.mrf.mxu2 }
 0x35b   : > { %v2909_v12 = vmax.f32 %v2852_v8, 0.0  ;;  %v2891_v9 = vadd.f32 %v2890_v11, %v2878_v36 }
 0x35d   : > { %v2913_v13 = vpack.c.bf16 %v2909_v12, %v2909_v12 }
 0x35f   : > { %3209 = vmatmul.bf16.vlgmr.msrb.gmra.mxu2 %v2913_v13 }
 0x360   : > { %v2853_v14 = vpop.f32.mrf.mxu3 }
 0x362   : > { %v2892_v15 = vpop.f32.mrf.mxu2 }
 0x378   : > { %v2903_v37 = vpop.f32.mrf.mxu3 }
 0x379   : > { %v2904_v18 = vadd.f32 %v2903_v37, %v2891_v9 }
 0x37b   : > { %v2910_v19 = vmax.f32 %v2904_v18, 0.0 }
 0x37d   : > { %v2914_v20 = vpack.c.bf16 %v2910_v19, %v2910_v19 }
 0x37f   : > { %3222 = vmatmul.bf16.vlgmr.msrb.gmra.mxu3 %v2914_v20 }
 0x380   : > { %v2905_v21 = vpop.f32.mrf.mxu3 }
 0x3bc   : > { %v3184_v24 = vpop.f32.mrf.mxu0 }
 0x3bd   : > { %v3185_v29 = vadd.f32 %v5151_v27, %v3184_v24 }
 0x3c4   : > { %v3186_v25 = vpop.f32.mrf.mxu0 }
 0x3cc   : > { %v3197_v10 = vpop.f32.mrf.mxu1 }
 0x3cd   : > { %v3198_v22 = vadd.f32 %v3197_v10, %v3185_v29 }
 0x3d4   : > { %v3199_v26 = vpop.f32.mrf.mxu1 }
 0x3e2   : > { %v3210_v28 = vpop.f32.mrf.mxu2 }
 0x3e3   : > { %v3211_v34 = vadd.f32 %v3210_v28, %v3198_v22 }
 0x3ea   : > { %v3212_v0 = vpop.f32.mrf.mxu2 }
 0x402   : > { %v3223_v30 = vpop.f32.mrf.mxu3 }
 0x403   : > { %v3224_v31 = vadd.f32 %v3223_v30, %v3211_v34 }
 0x405   : > { %3229 = vadd.xlane.f32.xlu1 %v3224_v31  ;;  %v3231_v63 = vmul.f32 %v3224_v31, %v3224_v31 }
 0x407   : > { %3232 = vadd.xlane.f32.xlu2 %v3231_v63 }
 0x40a   : > { %v3225_v32 = vpop.f32.mrf.mxu3 }
 0x40b   : > { %5305 = shalt.err (!%p5302_p8)
}
 0x40c   : > { %5067 = dma.vmem_to_hbm [thread:$0]  (%p5521_p5), %s3294_s26, 128, %s3296_s28, %s3267_s5  }
 0x40d   : > { %s5808_s7 = sld [smem:[#allocation27_spill]]  ;;  %s583_s21 = scalar_lea.vmem [#allocation10], %s3441_s29 }
 0x40e   : > { %s5809_s28 = sld [smem:[#allocation29_spill]]  ;;  %s3279_s23 = sshll.u32 %s583_s21, 4  ;;  %s3280_s23 = int_to_ptr.vmem [resolvable:$true] %s3279_s23 }
 0x40f   : > { %s5810_s15 = sld [smem:[#allocation28_spill]]  ;;  %s3262_s25 = scalar_lea.sflag [#allocation4], %s5590_s20 }
 0x413   : > { %v5152_v53 = vld [vmem:[%s5808_s7] ss:$0 sm:$0xff] }
 0x414   : > { %s3277_s5 = scalar_lea.hbm %s5809_s28, %s4726_s18  ;;  %s5326_s7 = scalar_lea.hbm %s5809_s28, 16 }
 0x415   : > { %v5153_v56 = vld [vmem:[%s5810_s15] ss:$0 sm:$0xff]  ;;  %s3281_s24 = sshll.u32 %s3277_s5, 4  ;;  %s3282_s24 = int_to_ptr.hbm [resolvable:$true] %s3281_s24 }
 0x416   : > { %s5320_s30 = sshra.s32 %s3282_s24, 4  ;;  %s5321_s30 = int_to_ptr.hbm [resolvable:$true] %s5320_s30 }
 0x417   : > { %s5322_s18 = scalar_lea.hbm %s5321_s30, 8  ;;  %p5327_p12 = scmp.lt.s32.totalorder %s5321_s30, %s5809_s28 }
 0x418   : > { %p5323_p9 = scmp.ne.s32.totalorder %s5321_s30, %s5322_s18  ;;  %p5328_p13 = scmp.lt.s32.totalorder %s5326_s7, %s5322_s18 }
 0x41a   : > { %p5324_p10 = pnand %p5323_p9, %p5521_p5  ;;  %p5329_p0 = por %p5328_p13, %p5327_p12 }
 0x41c   : > { %p5325_p11 = pneg %p5324_p10 }
 0x41e   : > { %p5330_p1 = pnand %p5329_p0, %p5325_p11 }
 0x478   : > { %v3230_v33 = vpop.xlane.xlu1 %3229 }
 0x479   : > { %v3234_v35 = vmul.f32 0.0078125, %v3230_v33 }
 0x47a   : > { %v3233_v38 = vpop.xlane.xlu2 %3232 }
 0x47b   : > { %v3236_v39 = vmul.f32 %v3234_v35, %v3234_v35  ;;  %v3235_v41 = vmul.f32 0.0078125, %v3233_v38  ;;  %v3250_v52 = vsub.f32 %v3224_v31, %v3234_v35 }
 0x47d   : > { %v3237_v42 = vsub.f32 %v3235_v41, %v3236_v39 }
 0x47f   : > { %v3238_v43 = vmax.f32 %v3237_v42, 0.0 }
 0x481   : > { %v3239_v44 = vadd.f32 1e-05, %v3238_v43 }
 0x483   : > { %5156 = vrsqrt.f32 %v3239_v44  ;;  %vm3246_vm4 = vweird.f32 %v3239_v44 }
 0x489   : > { %v5157_v45 = vpop.eup %5156 }
 0x48a   : > { %v3241_v46 = vmul.f32 %v5157_v45, %v3239_v44  ;;  %vm3247_vm3 = vweird.f32 %v5157_v45 }
 0x48b   : > { %vm3248_vm5 = vmor %vm3246_vm4, %vm3247_vm3 }
 0x48c   : > { %v3242_v48 = vmul.f32 %v5157_v45, %v3241_v46 }
 0x48e   : > { %v3243_v49 = vmul.f32 0.5, %v3242_v48 }
 0x490   : > { %v3244_v50 = vsub.f32 1.5, %v3243_v49 }
 0x492   : > { %v3245_v51 = vmul.f32 %v5157_v45, %v3244_v50 }
 0x494   : > { %v3249_v54 = vsel %vm3248_vm5, %v5157_v45, %v3245_v51 }
 0x495   : > { %v3251_v55 = vmul.f32 %v3250_v52, %v3249_v54 }
 0x497   : > { %v3255_v23 = vmul.f32 %v5152_v53, %v3251_v55 }
 0x499   : > { %v3259_v57 = vadd.f32 %v5153_v56, %v3255_v23 }
 0x49b   : > { %3260 = vst [vmem:[%s583_s21] sm:$0xff] %v3259_v57 }
 0x49c   : > { %5333 = shalt.err (!%p5330_p1)
}
 0x49d   : > { %5066 = dma.vmem_to_hbm [thread:$0]  (%p5521_p5), %s3280_s23, 128, %s3282_s24, %s3262_s25  }
 0x49e PF: > { %s5811_s20 = sld [smem:[#allocation20_spill]] }
 0x49f   : > { %s5812_s26 = sld [smem:[#allocation18_spill]] }
 0x4a4   : > { %p5098_p2 = scmp.ge.s32.totalorder %s5811_s20, 2 }
 0x4a5   : > { %s3307_s13 = sand.u32 1, %s5812_s26  }
 0x4a6   : > { %p5084_p3 = pnand %p5098_p2, %p5525_p6  ;;  %s3308_s14 = scalar_lea.sflag [#allocation4], %s3307_s13 }
 0x4a8   : > { %p5085_p4 = pneg %p5084_p3 }
 0x4aa   : > { %5363 = dma.done.wait (%p5085_p4), %s3308_s14, 128  }
 0x4ab   : > { %5365 = vsyncadd (%p5085_p4), %s3308_s14, 4294967168  ;;  %s3318_s15 = scalar_lea.sflag [#allocation12], %s3307_s13 }
 0x4ac   : > { %5367 = dma.done.wait (%p5085_p4), %s3318_s15, 128  }
 0x4ad   : > { %5369 = vsyncadd (%p5085_p4), %s3318_s15, 4294967168  ;;  %s5814_s24 = sld [smem:[#allocation21_spill]]  ;;  %s5817_s21 = smov %s5376_s22 }
 0x4ae   : > { %s5815_s30 = sld [smem:[#allocation19_spill]] }
 0x4af   : > { %s5816_s23 = sld [smem:[#allocation22_spill]] }
 0x4b3   : > { %p33_p5 = scmp.ge.s32.totalorder %s5814_s24, 4  }
 0x4b4   : > { %s5818_s22 = smov %s5815_s30 }
 0x4b5   :  { %35 = sbr.rel (!%p33_p5) target bundleno = 15 (0xf), region = 149 }
 0x4ba   :  { %3324 = vsyncpa [#allocation3], 1 }
 0x4bb   :  { %3326 = vsyncpa [#allocation3 + $0x1], 1 }
 0x4bc   :  { %3327 = vsyncpa [#allocation6], 1 }
 0x4bd   :  { %3328 = vsyncpa [#allocation9], 1 }
 0x4be   :  { %3329 = vsyncpa [#allocation4], 1 }
 0x4bf   :  { %3331 = vsyncpa [#allocation4 + $0x1], 1 }
 0x4c0   :  { %3332 = vsyncpa [#allocation12], 1 }
 0x4c1   :  { %3334 = vsyncpa [#allocation12 + $0x1], 1 }

</bundles_post_ra>
